<compile_context>
chip_gen: v7x
topology: tpu7x:2x2x1
jax: 0.10.0
libtpu: 0.0.40
codegen_flags: <defaults>
</compile_context>

<pallas_src>
import functools

import jax
import jax.numpy as jnp
from jax.experimental import pallas as pl
from jax.experimental.pallas import tpu as pltpu


def _round_up(x, m):
    return (x + m - 1) // m * m


def _ffn_kernel(x_ref, w1_ref, b1_ref, w2_ref, b2_ref, o_ref):
    # x_ref:  (tm, C)  bf16   tile of flattened (B*T, C) input rows
    # w1_ref: (C, H)   bf16   first linear weight (pre-transposed, resident)
    # b1_ref: (1, H)   f32
    # w2_ref: (H, C)   bf16   second linear weight (pre-transposed, resident)
    # b2_ref: (1, C)   f32
    # o_ref:  (tm, C)  f32/x-dtype
    b1 = b1_ref[...]                      # load biases once per invocation (f32)
    b2 = b2_ref[...]
    # First matmul on the MXU with f32 accumulation.
    h = jnp.dot(x_ref[...], w1_ref[...], preferred_element_type=jnp.float32)
    h = jnp.maximum(h + b1, 0.0)          # bias + ReLU in f32 on the VPU
    # Second matmul: cast activations to bf16 for the MXU, accumulate in f32.
    y = jnp.dot(h.astype(w2_ref.dtype), w2_ref[...],
                preferred_element_type=jnp.float32)
    y = y + b2
    # TODO(synk): Dropout(p=0.1) is identity here (eval mode); training-mode
    # dropout would use pltpu.prng_seed + pltpu.stateful_bernoulli.
    o_ref[...] = y.astype(o_ref.dtype)


@functools.partial(jax.jit, static_argnames=("block_m",))
def feed_forward(x, w1, b1, w2, b2, *, block_m=256):
    """Fused MLP forward.

    x: (B, T, C);  w1: (C, 4C);  b1: (4C,);  w2: (4C, C);  b2: (C,).
    Weights are stored pre-transposed as (in_features, out_features).
    """
    B, T, C = x.shape
    H = w1.shape[1]
    M = B * T

    # Row tile: as large as requested, never bigger than the (8-aligned)
    # problem; pad the row count so the grid covers it exactly.
    tm = min(block_m, _round_up(M, 8))
    Mp = _round_up(M, tm)
    grid_m = Mp // tm

    x2d = x.reshape(M, C)
    if Mp != M:
        x2d = jnp.pad(x2d, ((0, Mp - M), (0, 0)))

    # bf16 matmul inputs (f32 accumulation in-kernel); biases stay f32.
    # (In a real model, store the weights in bf16 to avoid this convert.)
    x2d = x2d.astype(jnp.bfloat16)
    w1b = w1.astype(jnp.bfloat16)
    w2b = w2.astype(jnp.bfloat16)
    b1_2d = b1.reshape(1, H).astype(jnp.float32)
    b2_2d = b2.reshape(1, C).astype(jnp.float32)

    # Explicit VMEM budget: double-buffered x/out tiles, resident bf16 weights
    # (x2 pipeline buffers), sublane-padded biases, plus the (tm, H) f32
    # intermediate.  Generous 1.5x margin, floor at 32 MiB, cap at 128 MiB.
    vmem_bytes = (
        2 * tm * C * (2 + 4)            # x tile (bf16) + out tile (f32), double-buffered
        + 2 * (C * H + H * C) * 2       # W1 + W2 (bf16), two pipeline buffers each
        + 2 * 8 * (H + C) * 4           # biases (sublane-padded), two buffers
        + tm * H * 4                    # first-matmul f32 intermediate
    )
    vmem_limit = min(128 * 1024 * 1024, max(32 * 1024 * 1024, int(1.5 * vmem_bytes)))

    out2d = pl.pallas_call(
        _ffn_kernel,
        out_shape=jax.ShapeDtypeStruct((Mp, C), x.dtype),
        grid_spec=pltpu.PrefetchScalarGridSpec(
            num_scalar_prefetch=0,
            grid=(grid_m,),
            in_specs=[
                pl.BlockSpec((tm, C), lambda i: (i, 0)),   # x rows (pipelined)
                pl.BlockSpec((C, H), lambda i: (0, 0)),    # W1 (grid-invariant)
                pl.BlockSpec((1, H), lambda i: (0, 0)),    # b1
                pl.BlockSpec((H, C), lambda i: (0, 0)),    # W2 (grid-invariant)
                pl.BlockSpec((1, C), lambda i: (0, 0)),    # b2
            ],
            out_specs=pl.BlockSpec((tm, C), lambda i: (i, 0)),
        ),
        compiler_params=pltpu.CompilerParams(
            dimension_semantics=("parallel",),   # shard row tiles across TCs (v7x)
            vmem_limit_bytes=vmem_limit,
        ),
    )(x2d, w1b, b1_2d, w2b, b2_2d)

    return out2d[:M].reshape(B, T, C)


def init_params(key, n_embd):
    """Deterministic init mimicking nn.Linear default (U(-1/sqrt(fan_in), ..))."""
    hidden = 4 * n_embd
    k1, k2, k3, k4 = jax.random.split(key, 4)
    bound1 = 1.0 / (n_embd ** 0.5)
    bound2 = 1.0 / (hidden ** 0.5)
    # Stored as (in, out) so the kernel uses x @ W directly.
    w1 = jax.random.uniform(k1, (n_embd, hidden), jnp.float32, -bound1, bound1)
    b1 = jax.random.uniform(k2, (hidden,), jnp.float32, -bound1, bound1)
    w2 = jax.random.uniform(k3, (hidden, n_embd), jnp.float32, -bound2, bound2)
    b2 = jax.random.uniform(k4, (n_embd,), jnp.float32, -bound2, bound2)
    return w1, b1, w2, b2


if __name__ == "__main__":
    key = jax.random.PRNGKey(0)
    k_x, k_p = jax.random.split(key)

    # C is a multiple of 128 (lane-dense stores), H = 512 is a multiple of 256,
    # and B*T = 400 is NOT a multiple of the 256-row tile, exercising padding;
    # padded grid is 2 tiles so both v7x TensorCores get work.
    B, T, n_embd = 2, 200, 128          # hidden = 512
    x = jax.random.normal(k_x, (B, T, n_embd), jnp.float32)
    w1, b1, w2, b2 = init_params(k_p, n_embd)

    out = feed_forward(x, w1, b1, w2, b2)
    out = jax.block_until_ready(out)

    # Reference in plain JAX using the same bf16-inputs / f32-accumulation
    # recipe (dropout is identity in eval mode).
    xb = x.reshape(-1, n_embd).astype(jnp.bfloat16)
    h = jnp.maximum(
        jnp.dot(xb, w1.astype(jnp.bfloat16), preferred_element_type=jnp.float32) + b1,
        0.0)
    ref = jnp.dot(h.astype(jnp.bfloat16), w2.astype(jnp.bfloat16),
                  preferred_element_type=jnp.float32) + b2
    ref = ref.reshape(B, T, n_embd)

    assert out.shape == (B, T, n_embd)
    assert out.dtype == x.dtype
    assert jnp.allclose(out, ref, atol=2e-2, rtol=2e-2), \
        float(jnp.max(jnp.abs(out - ref)))

    print("KERNEL_OK")
</pallas_src>

<mosaic_0001>
module attributes {stable_mosaic.version = 11 : i64} {
  func.func @_ffn_kernel(%arg0: i32, %arg1: memref<256x128xbf16, #tpu.memory_space<vmem>>, %arg2: memref<128x512xbf16, #tpu.memory_space<vmem>>, %arg3: memref<1x512xf32, #tpu.memory_space<vmem>>, %arg4: memref<512x128xbf16, #tpu.memory_space<vmem>>, %arg5: memref<1x128xf32, #tpu.memory_space<vmem>>, %arg6: memref<256x128xf32, #tpu.memory_space<vmem>>) attributes {dimension_semantics = [#tpu.dimension_semantics<parallel>], iteration_bounds = array<i64: 2>, scalar_prefetch = 0 : i64, scratch_operands = 0 : i64, tpu.core_type = #tpu.core_type<tc>, window_params = [{transform_indices = @transform_0, window_bounds = array<i64: 256, 128>}, {pipeline_mode = #tpu.pipeline_mode<synchronous>, transform_indices = @transform_1, window_bounds = array<i64: 128, 512>}, {pipeline_mode = #tpu.pipeline_mode<synchronous>, transform_indices = @transform_2, window_bounds = array<i64: 1, 512>}, {pipeline_mode = #tpu.pipeline_mode<synchronous>, transform_indices = @transform_3, window_bounds = array<i64: 512, 128>}, {pipeline_mode = #tpu.pipeline_mode<synchronous>, transform_indices = @transform_4, window_bounds = array<i64: 1, 128>}, {transform_indices = @transform_5, window_bounds = array<i64: 256, 128>}]} {
    %c0 = arith.constant 0 : index
    %c0_0 = arith.constant 0 : index
    %0 = vector.load %arg3[%c0, %c0_0] : memref<1x512xf32, #tpu.memory_space<vmem>>, vector<1x512xf32>
    %c0_1 = arith.constant 0 : index
    %c0_2 = arith.constant 0 : index
    %1 = vector.load %arg5[%c0_1, %c0_2] : memref<1x128xf32, #tpu.memory_space<vmem>>, vector<1x128xf32>
    %c0_3 = arith.constant 0 : index
    %c0_4 = arith.constant 0 : index
    %2 = vector.load %arg1[%c0_3, %c0_4] : memref<256x128xbf16, #tpu.memory_space<vmem>>, vector<256x128xbf16>
    %c0_5 = arith.constant 0 : index
    %c0_6 = arith.constant 0 : index
    %3 = vector.load %arg2[%c0_5, %c0_6] : memref<128x512xbf16, #tpu.memory_space<vmem>>, vector<128x512xbf16>
    %cst = arith.constant dense<0.000000e+00> : vector<256x512xf32>
    %4 = tpu.matmul %2, %3, %cst {dimension_numbers = #tpu.dot_dimension_numbers<[1], [0], [0], [1], [0, 0, 1, 1], [], []>} : vector<256x128xbf16>, vector<128x512xbf16>, vector<256x512xf32> -> vector<256x512xf32>
    %5 = vector.broadcast %0 : vector<1x512xf32> to vector<256x512xf32>
    %6 = arith.addf %4, %5 : vector<256x512xf32>
    %cst_7 = arith.constant 0.000000e+00 : f32
    %7 = vector.broadcast %cst_7 : f32 to vector<256x512xf32>
    %8 = arith.maximumf %6, %7 : vector<256x512xf32>
    %9 = arith.truncf %8 : vector<256x512xf32> to vector<256x512xbf16>
    %c0_8 = arith.constant 0 : index
    %c0_9 = arith.constant 0 : index
    %10 = vector.load %arg4[%c0_8, %c0_9] : memref<512x128xbf16, #tpu.memory_space<vmem>>, vector<512x128xbf16>
    %cst_10 = arith.constant dense<0.000000e+00> : vector<256x128xf32>
    %11 = tpu.matmul %9, %10, %cst_10 {dimension_numbers = #tpu.dot_dimension_numbers<[1], [0], [0], [1], [0, 0, 1, 1], [], []>} : vector<256x512xbf16>, vector<512x128xbf16>, vector<256x128xf32> -> vector<256x128xf32>
    %12 = vector.broadcast %1 : vector<1x128xf32> to vector<256x128xf32>
    %13 = arith.addf %11, %12 : vector<256x128xf32>
    %c0_11 = arith.constant 0 : index
    %c0_12 = arith.constant 0 : index
    %14 = vector.load %arg6[%c0_11, %c0_12] : memref<256x128xf32, #tpu.memory_space<vmem>>, vector<256x128xf32>
    tpu.vector_store %arg6[%c0_11, %c0_12], %13 {strides = array<i32>} : memref<256x128xf32, #tpu.memory_space<vmem>>, vector<256x128xf32>,
    return
  }
  func.func @transform_0(%arg0: i32) -> (i32, i32) {
    %c0_i32 = arith.constant 0 : i32
    %c0_i32_0 = arith.constant 0 : i32
    return %arg0, %c0_i32 : i32, i32
  }
  func.func @transform_1(%arg0: i32) -> (i32, i32) {
    %c0_i32 = arith.constant 0 : i32
    %c0_i32_0 = arith.constant 0 : i32
    %c0_i32_1 = arith.constant 0 : i32
    return %c0_i32, %c0_i32_0 : i32, i32
  }
  func.func @transform_2(%arg0: i32) -> (i32, i32) {
    %c0_i32 = arith.constant 0 : i32
    %c0_i32_0 = arith.constant 0 : i32
    %c0_i32_1 = arith.constant 0 : i32
    return %c0_i32, %c0_i32_0 : i32, i32
  }
  func.func @transform_3(%arg0: i32) -> (i32, i32) {
    %c0_i32 = arith.constant 0 : i32
    %c0_i32_0 = arith.constant 0 : i32
    %c0_i32_1 = arith.constant 0 : i32
    return %c0_i32, %c0_i32_0 : i32, i32
  }
  func.func @transform_4(%arg0: i32) -> (i32, i32) {
    %c0_i32 = arith.constant 0 : i32
    %c0_i32_0 = arith.constant 0 : i32
    %c0_i32_1 = arith.constant 0 : i32
    return %c0_i32, %c0_i32_0 : i32, i32
  }
  func.func @transform_5(%arg0: i32) -> (i32, i32) {
    %c0_i32 = arith.constant 0 : i32
    %c0_i32_0 = arith.constant 0 : i32
    return %arg0, %c0_i32 : i32, i32
  }
}

</mosaic_0001>

<bundles_post_ra>
// kernel: feed_forward.1
= control target key start
LH: loop header
LB: loop body
LE: loop exit
PB: predicated region body
PF: predicated region fallthrough
CT: control target
= control target key end

     0   :  { %s2282_s18 = smov 0   ;;  %s2755_s0 = inlined_call_operand.vmem [shape: bf16[512,128], index: 0, kind: input, shape index: {}]   ;;  %s2756_s1 = inlined_call_operand.vmem [shape: bf16[128,512], index: 1, kind: input, shape index: {}]   ;;  %s2757_s2 = inlined_call_operand.vmem [shape: f32[1,512], index: 2, kind: input, shape index: {}]   ;;  %s2758_s3 = inlined_call_operand.vmem [shape: bf16[512,128], index: 3, kind: input, shape index: {}]   ;;  %s2759_s4 = inlined_call_operand.vmem [shape: f32[1,128], index: 4, kind: input, shape index: {}]   ;;  %s2760_s5 = inlined_call_operand.vmem [shape: f32[512,128], index: 5, kind: output, shape index: {}]  }
   0x1 LB: > { %s1822_s19 = sadd.s32 4294967295, %s2249_s18   ;;  %p1826_p0 = scmp.ge.s32.totalorder %s2249_s18, 1  ;;  %s2249_s18 = sphi %s2282_s18, %s15_s18  }
   0x2   : > { %p188_p1 = scmp.lt.s32.totalorder %s2249_s18, 3 }
   0x4   : > { %p189_p2 = pnand %p1826_p0, %p188_p1 }
   0x5   : > { %v2147_v0 = vld [vmem:[%s2756_s1 + $0x4] ss:$16 sps:$4 sm:$0xff] (!%p189_p2)   ;;  %v2149_v1 = vld [vmem:[%s2756_s1 + $0xc] ss:$16 sps:$4 sm:$0xff] (!%p189_p2)   ;;  %v2251_v2 = vmov (!%p189_p2), 0   ;;  %s1827_s13 = sshll.u32 (!%p189_p2), %s1822_s19, 5 }
   0x6   : > { %192 = sbr.rel (%p189_p2) target bundleno = 603 (0x25b), region = 40  ;;  %604 = vmatprep.mubr.bf16.mxu0 (!%p189_p2), %v2251_v2  ;;  %797 = vmatprep.mubr.bf16.mxu1 (!%p189_p2), %v2251_v2  ;;  %v2151_v3 = vld [vmem:[%s2756_s1] ss:$16 sps:$4 sm:$0xff] (!%p189_p2)   ;;  %v2152_v4 = vld [vmem:[%s2756_s1 + $0x8] ss:$16 sps:$4 sm:$0xff] (!%p189_p2)   ;;  %p217_p3 = scmp.lt.s32.totalorder (!%p189_p2), %s1827_s13, 63 }
   0x7   : > { %572 = vmatprep.subr.bf16.mxu0 (!%p189_p2), %v2147_v0  ;;  %765 = vmatprep.subr.bf16.mxu1 (!%p189_p2), %v2149_v1  ;;  %v2153_v5 = vld [vmem:[%s2756_s1 + $0x24] ss:$16 sps:$4 sm:$0xff] (!%p189_p2)   ;;  %v2155_v6 = vld [vmem:[%s2756_s1 + $0x2c] ss:$16 sps:$4 sm:$0xff] (!%p189_p2)   ;;  %v2157_v7 = vld [vmem:[%s2756_s1 + $0x20] ss:$16 sps:$4 sm:$0xff] (!%p189_p2)  }
   0x8   : > { %573 = vmatpush1.bf16.msra.mxu0 (!%p189_p2), %v2151_v3  ;;  %766 = vmatpush1.bf16.msra.mxu1 (!%p189_p2), %v2152_v4  ;;  %v2158_v8 = vld [vmem:[%s2756_s1 + $0x28] ss:$16 sps:$4 sm:$0xff] (!%p189_p2)   ;;  %v2159_v9 = vld [vmem:[%s2756_s1 + $0x44] ss:$16 sps:$4 sm:$0xff] (!%p189_p2)   ;;  %v2161_v10 = vld [vmem:[%s2756_s1 + $0x4c] ss:$16 sps:$4 sm:$0xff] (!%p189_p2)  }
   0x9   : > { %574 = vmatprep.subr.bf16.mxu0 (!%p189_p2), %v2153_v5  ;;  %767 = vmatprep.subr.bf16.mxu1 (!%p189_p2), %v2155_v6  ;;  %v2163_v11 = vld [vmem:[%s2756_s1 + $0x40] ss:$16 sps:$4 sm:$0xff] (!%p189_p2)   ;;  %v2164_v12 = vld [vmem:[%s2756_s1 + $0x48] ss:$16 sps:$4 sm:$0xff] (!%p189_p2)   ;;  %v2165_v13 = vld [vmem:[%s2756_s1 + $0x64] ss:$16 sps:$4 sm:$0xff] (!%p189_p2)  }
   0xa   : > { %v2167_v14 = vld [vmem:[%s2756_s1 + $0x6c] ss:$16 sps:$4 sm:$0xff] (!%p189_p2)   ;;  %v2169_v15 = vld [vmem:[%s2756_s1 + $0x60] ss:$16 sps:$4 sm:$0xff] (!%p189_p2)   ;;  %v2170_v16 = vld [vmem:[%s2756_s1 + $0x68] ss:$16 sps:$4 sm:$0xff] (!%p189_p2)  }
   0xb   : > { %v2171_v17 = vld [vmem:[%s2756_s1 + $0x84] ss:$16 sps:$4 sm:$0xff] (!%p189_p2)   ;;  %v2173_v18 = vld [vmem:[%s2756_s1 + $0x8c] ss:$16 sps:$4 sm:$0xff] (!%p189_p2)   ;;  %v2175_v19 = vld [vmem:[%s2756_s1 + $0x80] ss:$16 sps:$4 sm:$0xff] (!%p189_p2)  }
   0xc   : > { %575 = vmatpush1.bf16.msra.mxu0 (!%p189_p2), %v2157_v7  ;;  %768 = vmatpush1.bf16.msra.mxu1 (!%p189_p2), %v2158_v8  ;;  %v2176_v20 = vld [vmem:[%s2756_s1 + $0x88] ss:$16 sps:$4 sm:$0xff] (!%p189_p2)   ;;  %v2177_v21 = vld [vmem:[%s2756_s1 + $0xa4] ss:$16 sps:$4 sm:$0xff] (!%p189_p2)   ;;  %v2179_v22 = vld [vmem:[%s2756_s1 + $0xac] ss:$16 sps:$4 sm:$0xff] (!%p189_p2)  }
   0xd   : > { %576 = vmatprep.subr.bf16.mxu0 %v2159_v9  ;;  %769 = vmatprep.subr.bf16.mxu1 %v2161_v10  ;;  %s2762_s13 = smov (!%p217_p3, %s1827_s13), 63  ;;  %v2181_v23 = vld [vmem:[%s2756_s1 + $0xa0] ss:$16 sps:$4 sm:$0xff]   ;;  %v2182_v24 = vld [vmem:[%s2756_s1 + $0xa8] ss:$16 sps:$4 sm:$0xff]  }
   0xe   : > { %s1828_s17 = sshll.u32 %s2762_s13, 2  ;;  %v2183_v25 = vld [vmem:[%s2756_s1 + $0xc4] ss:$16 sps:$4 sm:$0xff]   ;;  %v2185_v26 = vld [vmem:[%s2756_s1 + $0xcc] ss:$16 sps:$4 sm:$0xff]   ;;  %s1830_s21 = sshll.u32 %s2762_s13, 3 }
   0xf   : > { %s2373_s27 = scalar_lea.vmem %s2755_s0, %s1828_s17  ;;  %v2187_v27 = vld [vmem:[%s2756_s1 + $0xc0] ss:$16 sps:$4 sm:$0xff]   ;;  %v2188_v28 = vld [vmem:[%s2756_s1 + $0xc8] ss:$16 sps:$4 sm:$0xff]   ;;  %v2189_v29 = vld [vmem:[%s2756_s1 + $0xe4] ss:$16 sps:$4 sm:$0xff]   ;;  %s2687_s19 = scalar_lea.vmem %s2760_s5, %s1830_s21 }
  0x10   : > { %577 = vmatpush1.bf16.msra.mxu0 %v2163_v11  ;;  %770 = vmatpush1.bf16.msra.mxu1 %v2164_v12  ;;  %v2191_v30 = vld [vmem:[%s2756_s1 + $0xec] ss:$16 sps:$4 sm:$0xff]   ;;  %v2193_v31 = vld [vmem:[%s2756_s1 + $0xe0] ss:$16 sps:$4 sm:$0xff]   ;;  %v2194_v32 = vld [vmem:[%s2756_s1 + $0xe8] ss:$16 sps:$4 sm:$0xff]  }
  0x11   : > { %578 = vmatprep.subr.bf16.mxu0 %v2165_v13  ;;  %771 = vmatprep.subr.bf16.mxu1 %v2167_v14  ;;  %v2195_v33 = vld [vmem:[%s2373_s27] sm:$0xff]   ;;  %v2196_v38 = vld [vmem:[%s2373_s27 + $0x8] sm:$0xff]   ;;  %v2197_v43 = vld [vmem:[%s2373_s27 + $0x10] sm:$0xff]  }
  0x12   : > { %v2207_v34 = vld [vmem:[%s2758_s3 + $0x40] sm:$0xff]   ;;  %v2213_v39 = vld [vmem:[%s2758_s3 + $0x48] sm:$0xff]   ;;  %v2219_v44 = vld [vmem:[%s2758_s3 + $0x50] sm:$0xff]  }
  0x13   : > { %v2208_v35 = vld [vmem:[%s2758_s3] sm:$0xff]   ;;  %v2214_v40 = vld [vmem:[%s2758_s3 + $0x8] sm:$0xff]   ;;  %v2220_v45 = vld [vmem:[%s2758_s3 + $0x10] sm:$0xff]  }
  0x14   : > { %579 = vmatpush1.bf16.msra.mxu0 %v2169_v15  ;;  %772 = vmatpush1.bf16.msra.mxu1 %v2170_v16  ;;  %v2209_v36 = vld [vmem:[%s2758_s3 + $0xc0] sm:$0xff]   ;;  %v2215_v41 = vld [vmem:[%s2758_s3 + $0xc8] sm:$0xff]   ;;  %v2221_v46 = vld [vmem:[%s2758_s3 + $0xd0] sm:$0xff]  }
  0x15   : > { %580 = vmatprep.subr.bf16.mxu0 %v2171_v17  ;;  %773 = vmatprep.subr.bf16.mxu1 %v2173_v18  ;;  %v2211_v37 = vld [vmem:[%s2758_s3 + $0x80] sm:$0xff]   ;;  %v2217_v42 = vld [vmem:[%s2758_s3 + $0x88] sm:$0xff]   ;;  %v2222_v47 = vld [vmem:[%s2758_s3 + $0x90] sm:$0xff]   ;;  %v296_v18 = vlaneseq }
  0x16   : > { %v2223_v48 = vld [vmem:[%s2758_s3 + $0x58] sm:$0xff]   ;;  %v2227_v53 = vld [vmem:[%s2758_s3 + $0x60] sm:$0xff]   ;;  %v2231_v57 = vld [vmem:[%s2758_s3 + $0x68] sm:$0xff]  }
  0x17   : > { %v2224_v49 = vld [vmem:[%s2758_s3 + $0x18] sm:$0xff]   ;;  %v2228_v54 = vld [vmem:[%s2758_s3 + $0x20] sm:$0xff]   ;;  %v2232_v58 = vld [vmem:[%s2758_s3 + $0x28] sm:$0xff]  }
  0x18   : > { %581 = vmatpush1.bf16.msra.mxu0 %v2175_v19  ;;  %774 = vmatpush1.bf16.msra.mxu1 %v2176_v20  ;;  %v2225_v50 = vld [vmem:[%s2758_s3 + $0xd8] sm:$0xff]   ;;  %v2229_v55 = vld [vmem:[%s2758_s3 + $0xe0] sm:$0xff]   ;;  %v2233_v59 = vld [vmem:[%s2758_s3 + $0xe8] sm:$0xff]   ;;  %v297_v19 = vshrl.u32 %v296_v18, 7 }
  0x19   : > { %582 = vmatprep.subr.bf16.mxu0 %v2177_v21  ;;  %775 = vmatprep.subr.bf16.mxu1 %v2179_v22  ;;  %v2198_v51 = vld [vmem:[%s2373_s27 + $0x18] sm:$0xff]   ;;  %v2230_v56 = vld [vmem:[%s2758_s3 + $0xa0] sm:$0xff]   ;;  %v2234_v61 = vld [vmem:[%s2758_s3 + $0xa8] sm:$0xff]  }
  0x1a   : > { %v2226_v52 = vld [vmem:[%s2758_s3 + $0x98] sm:$0xff]   ;;  %v2199_v60 = vld [vmem:[%s2373_s27 + $0x20] sm:$0xff]   ;;  %v2235_v62 = vld [vmem:[%s2758_s3 + $0x70] sm:$0xff]   ;;  %v298_v20 = vsub.s32 0, %v297_v19  ;;  %v306_v21 = vsub.s32 2, %v297_v19 }
  0x1b   : > { %v2236_v63 = vld [vmem:[%s2758_s3 + $0x30] sm:$0xff]   ;;  %v2239_v3 = vld [vmem:[%s2758_s3 + $0x78] sm:$0xff]   ;;  %v2200_v7 = vld [vmem:[%s2373_s27 + $0x28] sm:$0xff]  }
  0x1c   : > { %583 = vmatpush1.bf16.msra.mxu0 %v2181_v23  ;;  %776 = vmatpush1.bf16.msra.mxu1 %v2182_v24  ;;  %v2237_v0 = vld [vmem:[%s2758_s3 + $0xf0] sm:$0xff]   ;;  %v2240_v4 = vld [vmem:[%s2758_s3 + $0x38] sm:$0xff]   ;;  %v2203_v10 = vld [vmem:[%s2373_s27 + $0x40] sm:$0xff]   ;;  %v302_v23 = vsub.s32 1, %v297_v19  ;;  %v310_v24 = vsub.s32 3, %v297_v19 }
  0x1d   : > { %584 = vmatprep.subr.bf16.mxu0 %v2183_v25  ;;  %777 = vmatprep.subr.bf16.mxu1 %v2185_v26  ;;  %v2238_v1 = vld [vmem:[%s2758_s3 + $0xb0] sm:$0xff]   ;;  %v2241_v5 = vld [vmem:[%s2758_s3 + $0xf8] sm:$0xff]   ;;  %v2204_v11 = vld [vmem:[%s2373_s27 + $0x48] sm:$0xff]  }
  0x1e   : > { %v2242_v6 = vld [vmem:[%s2758_s3 + $0xb8] sm:$0xff]   ;;  %v2201_v8 = vld [vmem:[%s2373_s27 + $0x30] sm:$0xff]   ;;  %v2210_v14 = vld [vmem:[%s2373_s27 + $0x60] sm:$0xff]  }
  0x1f   : > { %v2202_v9 = vld [vmem:[%s2373_s27 + $0x38] sm:$0xff]   ;;  %v2205_v12 = vld [vmem:[%s2373_s27 + $0x50] sm:$0xff]   ;;  %v2212_v15 = vld [vmem:[%s2373_s27 + $0x68] sm:$0xff]  }
  0x20   : > { %585 = vmatpush1.bf16.msra.mxu0 %v2187_v27  ;;  %778 = vmatpush1.bf16.msra.mxu1 %v2188_v28  ;;  %v2206_v13 = vld [vmem:[%s2373_s27 + $0x58] sm:$0xff]   ;;  %v2216_v16 = vld [vmem:[%s2373_s27 + $0x70] sm:$0xff]   ;;  %v229_v22 = vld [vmem:[%s2757_s2] sm:$0xf] }
  0x21   : > { %586 = vmatprep.subr.bf16.mxu0 %v2189_v29  ;;  %779 = vmatprep.subr.bf16.mxu1 %v2191_v30  ;;  %v2218_v17 = vld [vmem:[%s2373_s27 + $0x78] sm:$0xff]   ;;  %v2541_v25 = vrot.slane %v229_v22, %v298_v20  ;;  %v2543_v26 = vrot.slane %v229_v22, %v306_v21  ;;  %v2545_v27 = vrot.slane %v229_v22, %v302_v23 }
  0x24   : > { %587 = vmatpush1.bf16.msra.mxu0 %v2193_v31  ;;  %780 = vmatpush1.bf16.msra.mxu1 %v2194_v32 }
  0x25   : > { %1914 = vmatprep.subr.bf16.mxu0 %v2207_v34  ;;  %2026 = vmatprep.subr.bf16.mxu1 %v2209_v36 }
  0x27   : > { %605 = vmatmul.mubr.bf16.vlgmr.msra.gmra.mrb[0].mxu0 %v2195_v33  ;;  %798 = vmatmul.mubr.bf16.vlgmr.msra.gmra.mrb[0].mxu1 %v2195_v33 }
  0x28   : > { %614 = vmatprep.mubr.bf16.mxu0 %v2251_v2  ;;  %807 = vmatprep.mubr.bf16.mxu1 %v2251_v2 }
  0x29   : > { %1915 = vmatpush3.bf16.msra.mxu0 %v2208_v35  ;;  %2027 = vmatpush3.bf16.msra.mxu1 %v2211_v37 }
  0x2a   : > { %1916 = vmatprep.subr.bf16.mxu0 %v2213_v39  ;;  %2028 = vmatprep.subr.bf16.mxu1 %v2215_v41 }
  0x2d   : > { %1917 = vmatpush3.bf16.msra.mxu0 %v2214_v40  ;;  %2029 = vmatpush3.bf16.msra.mxu1 %v2217_v42 }
  0x2e   : > { %1918 = vmatprep.subr.bf16.mxu0 %v2219_v44  ;;  %2030 = vmatprep.subr.bf16.mxu1 %v2221_v46 }
  0x2f   : > { %615 = vmatmul.mubr.bf16.gmra.mrb[4].mxu0 %v2196_v38  ;;  %808 = vmatmul.mubr.bf16.gmra.mrb[4].mxu1 %v2196_v38 }
  0x30   : > { %624 = vmatprep.mubr.bf16.mxu0 %v2251_v2  ;;  %817 = vmatprep.mubr.bf16.mxu1 %v2251_v2 }
  0x31   : > { %1919 = vmatpush3.bf16.msra.mxu0 %v2220_v45  ;;  %2031 = vmatpush3.bf16.msra.mxu1 %v2222_v47 }
  0x32   : > { %1920 = vmatprep.subr.bf16.mxu0 %v2223_v48  ;;  %2032 = vmatprep.subr.bf16.mxu1 %v2225_v50 }
  0x35   : > { %1921 = vmatpush3.bf16.msra.mxu0 %v2224_v49  ;;  %2033 = vmatpush3.bf16.msra.mxu1 %v2226_v52 }
  0x36   : > { %1922 = vmatprep.subr.bf16.mxu0 %v2227_v53  ;;  %2034 = vmatprep.subr.bf16.mxu1 %v2229_v55 }
  0x37   : > { %625 = vmatmul.mubr.bf16.gmra.mrb[8].mxu0 %v2197_v43  ;;  %818 = vmatmul.mubr.bf16.gmra.mrb[8].mxu1 %v2197_v43 }
  0x38   : > { %634 = vmatprep.mubr.bf16.mxu0 %v2251_v2  ;;  %827 = vmatprep.mubr.bf16.mxu1 %v2251_v2 }
  0x39   : > { %1923 = vmatpush3.bf16.msra.mxu0 %v2228_v54  ;;  %2035 = vmatpush3.bf16.msra.mxu1 %v2230_v56 }
  0x3a   : > { %1924 = vmatprep.subr.bf16.mxu0 %v2231_v57  ;;  %2036 = vmatprep.subr.bf16.mxu1 %v2233_v59 }
  0x3d   : > { %1925 = vmatpush3.bf16.msra.mxu0 %v2232_v58  ;;  %2037 = vmatpush3.bf16.msra.mxu1 %v2234_v61 }
  0x3e   : > { %1926 = vmatprep.subr.bf16.mxu0 %v2235_v62  ;;  %2038 = vmatprep.subr.bf16.mxu1 %v2237_v0 }
  0x3f   : > { %635 = vmatmul.mubr.bf16.gmra.mrb[12].mxu0 %v2198_v51  ;;  %828 = vmatmul.mubr.bf16.gmra.mrb[12].mxu1 %v2198_v51 }
  0x40   : > { %644 = vmatprep.mubr.bf16.mxu0 %v2251_v2  ;;  %837 = vmatprep.mubr.bf16.mxu1 %v2251_v2 }
  0x41   : > { %1927 = vmatpush3.bf16.msra.mxu0 %v2236_v63  ;;  %2039 = vmatpush3.bf16.msra.mxu1 %v2238_v1 }
  0x42   : > { %1928 = vmatprep.subr.bf16.mxu0 %v2239_v3  ;;  %2040 = vmatprep.subr.bf16.mxu1 %v2241_v5 }
  0x45   : > { %1929 = vmatpush3.bf16.msra.mxu0 %v2240_v4  ;;  %2041 = vmatpush3.bf16.msra.mxu1 %v2242_v6 }
  0x47   : > { %645 = vmatmul.mubr.bf16.gmra.mrb[16].mxu0 %v2199_v60  ;;  %838 = vmatmul.mubr.bf16.gmra.mrb[16].mxu1 %v2199_v60 }
  0x48   : > { %654 = vmatprep.mubr.bf16.mxu0 %v2251_v2  ;;  %847 = vmatprep.mubr.bf16.mxu1 %v2251_v2 }
  0x4f   : > { %655 = vmatmul.mubr.bf16.gmra.mrb[20].mxu0 %v2200_v7  ;;  %848 = vmatmul.mubr.bf16.gmra.mrb[20].mxu1 %v2200_v7 }
  0x50   : > { %664 = vmatprep.mubr.bf16.mxu0 %v2251_v2  ;;  %857 = vmatprep.mubr.bf16.mxu1 %v2251_v2 }
  0x57   : > { %665 = vmatmul.mubr.bf16.gmra.mrb[24].mxu0 %v2201_v8  ;;  %858 = vmatmul.mubr.bf16.gmra.mrb[24].mxu1 %v2201_v8 }
  0x58   : > { %674 = vmatprep.mubr.bf16.mxu0 %v2251_v2  ;;  %867 = vmatprep.mubr.bf16.mxu1 %v2251_v2 }
  0x5f   : > { %675 = vmatmul.mubr.bf16.gmra.mrb[28].mxu0 %v2202_v9  ;;  %868 = vmatmul.mubr.bf16.gmra.mrb[28].mxu1 %v2202_v9 }
  0x60   : > { %684 = vmatprep.mubr.bf16.mxu0 %v2251_v2  ;;  %877 = vmatprep.mubr.bf16.mxu1 %v2251_v2 }
  0x67   : > { %685 = vmatmul.mubr.bf16.gmra.mrb[32].mxu0 %v2203_v10  ;;  %878 = vmatmul.mubr.bf16.gmra.mrb[32].mxu1 %v2203_v10 }
  0x68   : > { %694 = vmatprep.mubr.bf16.mxu0 %v2251_v2  ;;  %887 = vmatprep.mubr.bf16.mxu1 %v2251_v2 }
  0x6f   : > { %695 = vmatmul.mubr.bf16.gmra.mrb[36].mxu0 %v2204_v11  ;;  %888 = vmatmul.mubr.bf16.gmra.mrb[36].mxu1 %v2204_v11 }
  0x70   : > { %704 = vmatprep.mubr.bf16.mxu0 %v2251_v2  ;;  %897 = vmatprep.mubr.bf16.mxu1 %v2251_v2 }
  0x77   : > { %705 = vmatmul.mubr.bf16.gmra.mrb[40].mxu0 %v2205_v12  ;;  %898 = vmatmul.mubr.bf16.gmra.mrb[40].mxu1 %v2205_v12 }
  0x78   : > { %714 = vmatprep.mubr.bf16.mxu0 %v2251_v2  ;;  %907 = vmatprep.mubr.bf16.mxu1 %v2251_v2 }
  0x7f   : > { %715 = vmatmul.mubr.bf16.gmra.mrb[44].mxu0 %v2206_v13  ;;  %908 = vmatmul.mubr.bf16.gmra.mrb[44].mxu1 %v2206_v13 }
  0x80   : > { %724 = vmatprep.mubr.bf16.mxu0 %v2251_v2  ;;  %917 = vmatprep.mubr.bf16.mxu1 %v2251_v2 }
  0x87   : > { %725 = vmatmul.mubr.bf16.gmra.mrb[48].mxu0 %v2210_v14  ;;  %918 = vmatmul.mubr.bf16.gmra.mrb[48].mxu1 %v2210_v14 }
  0x88   : > { %734 = vmatprep.mubr.bf16.mxu0 %v2251_v2  ;;  %927 = vmatprep.mubr.bf16.mxu1 %v2251_v2 }
  0x8f   : > { %735 = vmatmul.mubr.bf16.gmra.mrb[52].mxu0 %v2212_v15  ;;  %928 = vmatmul.mubr.bf16.gmra.mrb[52].mxu1 %v2212_v15 }
  0x90   : > { %744 = vmatprep.mubr.bf16.mxu0 %v2251_v2  ;;  %937 = vmatprep.mubr.bf16.mxu1 %v2251_v2 }
  0x97   : > { %745 = vmatmul.mubr.bf16.gmra.mrb[56].mxu0 %v2216_v16  ;;  %938 = vmatmul.mubr.bf16.gmra.mrb[56].mxu1 %v2216_v16 }
  0x98   : > { %754 = vmatprep.mubr.bf16.mxu0 %v2251_v2  ;;  %947 = vmatprep.mubr.bf16.mxu1 %v2251_v2  ;;  %v2547_v2 = vrot.slane %v229_v22, %v310_v24 }
  0x9f   : > { %755 = vmatmul.mubr.bf16.gmra.mrb[60].mxu0 %v2218_v17  ;;  %948 = vmatmul.mubr.bf16.gmra.mrb[60].mxu1 %v2218_v17 }
  0xfa   : > { %v606_v28 = vpop.f32.mrb[0].mxu0  ;;  %v799_v29 = vpop.f32.mrb[0].mxu1 }
  0xfb   : > { %v607_v30 = vadd.f32 %v606_v28, %v2541_v25  ;;  %v800_v31 = vadd.f32 %v799_v29, %v2543_v26  ;;  %v608_v32 = vpop.f32.mrb[1].mxu0  ;;  %v801_v33 = vpop.f32.mrb[1].mxu1 }
  0xfc   : > { %v609_v34 = vadd.f32 %v608_v32, %v2545_v27  ;;  %v802_v35 = vadd.f32 %v801_v33, %v2547_v2  ;;  %v610_v36 = vpop.f32.mrb[2].mxu0  ;;  %v803_v37 = vpop.f32.mrb[2].mxu1 }
  0xfd   : > { %v960_v38 = vmax.f32 %v800_v31, 0.0  ;;  %v611_v39 = vadd.f32 %v610_v36, %v2541_v25  ;;  %v804_v40 = vadd.f32 %v803_v37, %v2543_v26  ;;  %v612_v41 = vpop.f32.mrb[3].mxu0  ;;  %v805_v42 = vpop.f32.mrb[3].mxu1  ;;  %v958_v46 = vmax.f32 %v607_v30, 0.0 }
  0xfe   : > { %v961_v43 = vmax.f32 %v802_v35, 0.0  ;;  %v613_v44 = vadd.f32 %v612_v41, %v2545_v27  ;;  %v806_v45 = vadd.f32 %v805_v42, %v2547_v2  ;;  %v959_v49 = vmax.f32 %v609_v34, 0.0 }
  0xff   : > { %v962_v47 = vmax.f32 %v611_v39, 0.0  ;;  %v964_v48 = vmax.f32 %v804_v40, 0.0 }
 0x100   : > { %v963_v50 = vmax.f32 %v613_v44, 0.0  ;;  %v965_v51 = vmax.f32 %v806_v45, 0.0 }
 0x101   : > { %v1086_v52 = vpack.c.bf16 %v962_v47, %v958_v46  ;;  %v1088_v53 = vpack.c.bf16 %v964_v48, %v960_v38 }
 0x102   : > { %v1087_v54 = vpack.c.bf16 %v963_v50, %v959_v49  ;;  %v1089_v55 = vpack.c.bf16 %v965_v51, %v961_v43  ;;  %v616_v56 = vpop.f32.mrb[4].mxu0  ;;  %v809_v57 = vpop.f32.mrb[4].mxu1 }
 0x103   : > { %v617_v58 = vadd.f32 %v616_v56, %v2541_v25  ;;  %v810_v59 = vadd.f32 %v809_v57, %v2543_v26  ;;  %v618_v60 = vpop.f32.mrb[5].mxu0  ;;  %v811_v61 = vpop.f32.mrb[5].mxu1 }
 0x104   : > { %v619_v62 = vadd.f32 %v618_v60, %v2545_v27  ;;  %v812_v63 = vadd.f32 %v811_v61, %v2547_v2  ;;  %v620_v0 = vpop.f32.mrb[6].mxu0  ;;  %v813_v1 = vpop.f32.mrb[6].mxu1  ;;  %1444 = vmatprep.mubr.bf16.mxu0 %v1087_v54  ;;  %1605 = vmatprep.mubr.bf16.mxu1 %v1089_v55 }
 0x105   : > { %v968_v3 = vmax.f32 %v810_v59, 0.0  ;;  %v621_v4 = vadd.f32 %v620_v0, %v2541_v25  ;;  %v814_v5 = vadd.f32 %v813_v1, %v2543_v26  ;;  %v622_v6 = vpop.f32.mrb[7].mxu0  ;;  %v815_v7 = vpop.f32.mrb[7].mxu1  ;;  %1445 = vmatmul.mubr.bf16.vlgmr.msra.gmra.mrb[64].mxu0 %v1086_v52  ;;  %1606 = vmatmul.mubr.bf16.vlgmr.msra.gmra.mrb[64].mxu1 %v1088_v53  ;;  %v966_v11 = vmax.f32 %v617_v58, 0.0 }
 0x106   : > { %v969_v8 = vmax.f32 %v812_v63, 0.0  ;;  %v623_v9 = vadd.f32 %v622_v6, %v2545_v27  ;;  %v816_v10 = vadd.f32 %v815_v7, %v2547_v2  ;;  %v967_v14 = vmax.f32 %v619_v62, 0.0 }
 0x107   : > { %v970_v12 = vmax.f32 %v621_v4, 0.0  ;;  %v972_v13 = vmax.f32 %v814_v5, 0.0 }
 0x108   : > { %v971_v15 = vmax.f32 %v623_v9, 0.0  ;;  %v973_v16 = vmax.f32 %v816_v10, 0.0 }
 0x109   : > { %v1090_v17 = vpack.c.bf16 %v970_v12, %v966_v11  ;;  %v1092_v18 = vpack.c.bf16 %v972_v13, %v968_v3 }
 0x10a   : > { %v1091_v19 = vpack.c.bf16 %v971_v15, %v967_v14  ;;  %v1093_v20 = vpack.c.bf16 %v973_v16, %v969_v8  ;;  %v626_v21 = vpop.f32.mrb[8].mxu0  ;;  %v819_v22 = vpop.f32.mrb[8].mxu1 }
 0x10b   : > { %v627_v23 = vadd.f32 %v626_v21, %v2541_v25  ;;  %v820_v24 = vadd.f32 %v819_v22, %v2543_v26  ;;  %v628_v28 = vpop.f32.mrb[9].mxu0  ;;  %v821_v29 = vpop.f32.mrb[9].mxu1 }
 0x10c   : > { %v629_v30 = vadd.f32 %v628_v28, %v2545_v27  ;;  %v822_v31 = vadd.f32 %v821_v29, %v2547_v2  ;;  %v630_v32 = vpop.f32.mrb[10].mxu0  ;;  %v823_v33 = vpop.f32.mrb[10].mxu1  ;;  %1452 = vmatprep.mubr.bf16.mxu0 %v1091_v19  ;;  %1613 = vmatprep.mubr.bf16.mxu1 %v1093_v20 }
 0x10d   : > { %v976_v34 = vmax.f32 %v820_v24, 0.0  ;;  %v631_v35 = vadd.f32 %v630_v32, %v2541_v25  ;;  %v824_v36 = vadd.f32 %v823_v33, %v2543_v26  ;;  %v632_v37 = vpop.f32.mrb[11].mxu0  ;;  %v825_v38 = vpop.f32.mrb[11].mxu1  ;;  %1453 = vmatmul.mubr.bf16.gmra.mrb[68].mxu0 %v1090_v17  ;;  %1614 = vmatmul.mubr.bf16.gmra.mrb[68].mxu1 %v1092_v18  ;;  %v974_v42 = vmax.f32 %v627_v23, 0.0 }
 0x10e   : > { %v977_v39 = vmax.f32 %v822_v31, 0.0  ;;  %v633_v40 = vadd.f32 %v632_v37, %v2545_v27  ;;  %v826_v41 = vadd.f32 %v825_v38, %v2547_v2  ;;  %v975_v45 = vmax.f32 %v629_v30, 0.0 }
 0x10f   : > { %v978_v43 = vmax.f32 %v631_v35, 0.0  ;;  %v980_v44 = vmax.f32 %v824_v36, 0.0 }
 0x110   : > { %v979_v46 = vmax.f32 %v633_v40, 0.0  ;;  %v981_v47 = vmax.f32 %v826_v41, 0.0 }
 0x111   : > { %v1094_v48 = vpack.c.bf16 %v978_v43, %v974_v42  ;;  %v1096_v49 = vpack.c.bf16 %v980_v44, %v976_v34 }
 0x112   : > { %v1095_v50 = vpack.c.bf16 %v979_v46, %v975_v45  ;;  %v1097_v51 = vpack.c.bf16 %v981_v47, %v977_v39  ;;  %v636_v52 = vpop.f32.mrb[12].mxu0  ;;  %v829_v53 = vpop.f32.mrb[12].mxu1 }
 0x113   : > { %v637_v54 = vadd.f32 %v636_v52, %v2541_v25  ;;  %v830_v55 = vadd.f32 %v829_v53, %v2543_v26  ;;  %v638_v56 = vpop.f32.mrb[13].mxu0  ;;  %v831_v57 = vpop.f32.mrb[13].mxu1 }
 0x114   : > { %v639_v58 = vadd.f32 %v638_v56, %v2545_v27  ;;  %v832_v59 = vadd.f32 %v831_v57, %v2547_v2  ;;  %v640_v60 = vpop.f32.mrb[14].mxu0  ;;  %v833_v61 = vpop.f32.mrb[14].mxu1  ;;  %1460 = vmatprep.mubr.bf16.mxu0 %v1095_v50  ;;  %1621 = vmatprep.mubr.bf16.mxu1 %v1097_v51 }
 0x115   : > { %v984_v62 = vmax.f32 %v830_v55, 0.0  ;;  %v641_v63 = vadd.f32 %v640_v60, %v2541_v25  ;;  %v834_v0 = vadd.f32 %v833_v61, %v2543_v26  ;;  %v642_v1 = vpop.f32.mrb[15].mxu0  ;;  %v835_v3 = vpop.f32.mrb[15].mxu1  ;;  %1461 = vmatmul.mubr.bf16.gmra.mrb[72].mxu0 %v1094_v48  ;;  %1622 = vmatmul.mubr.bf16.gmra.mrb[72].mxu1 %v1096_v49  ;;  %v982_v7 = vmax.f32 %v637_v54, 0.0 }
 0x116   : > { %v985_v4 = vmax.f32 %v832_v59, 0.0  ;;  %v643_v5 = vadd.f32 %v642_v1, %v2545_v27  ;;  %v836_v6 = vadd.f32 %v835_v3, %v2547_v2  ;;  %v983_v10 = vmax.f32 %v639_v58, 0.0 }
 0x117   : > { %v986_v8 = vmax.f32 %v641_v63, 0.0  ;;  %v988_v9 = vmax.f32 %v834_v0, 0.0 }
 0x118   : > { %v987_v11 = vmax.f32 %v643_v5, 0.0  ;;  %v989_v12 = vmax.f32 %v836_v6, 0.0 }
 0x119   : > { %v1098_v13 = vpack.c.bf16 %v986_v8, %v982_v7  ;;  %v1100_v14 = vpack.c.bf16 %v988_v9, %v984_v62 }
 0x11a   : > { %v1099_v15 = vpack.c.bf16 %v987_v11, %v983_v10  ;;  %v1101_v16 = vpack.c.bf16 %v989_v12, %v985_v4  ;;  %v646_v17 = vpop.f32.mrb[16].mxu0  ;;  %v839_v18 = vpop.f32.mrb[16].mxu1 }
 0x11b   : > { %v647_v19 = vadd.f32 %v646_v17, %v2541_v25  ;;  %v840_v20 = vadd.f32 %v839_v18, %v2543_v26  ;;  %v648_v21 = vpop.f32.mrb[17].mxu0  ;;  %v841_v22 = vpop.f32.mrb[17].mxu1 }
 0x11c   : > { %v649_v23 = vadd.f32 %v648_v21, %v2545_v27  ;;  %v842_v24 = vadd.f32 %v841_v22, %v2547_v2  ;;  %v650_v28 = vpop.f32.mrb[18].mxu0  ;;  %v843_v29 = vpop.f32.mrb[18].mxu1  ;;  %1468 = vmatprep.mubr.bf16.mxu0 %v1099_v15  ;;  %1629 = vmatprep.mubr.bf16.mxu1 %v1101_v16 }
 0x11d   : > { %v992_v30 = vmax.f32 %v840_v20, 0.0  ;;  %v651_v31 = vadd.f32 %v650_v28, %v2541_v25  ;;  %v844_v32 = vadd.f32 %v843_v29, %v2543_v26  ;;  %v652_v33 = vpop.f32.mrb[19].mxu0  ;;  %v845_v34 = vpop.f32.mrb[19].mxu1  ;;  %1469 = vmatmul.mubr.bf16.gmra.mrb[76].mxu0 %v1098_v13  ;;  %1630 = vmatmul.mubr.bf16.gmra.mrb[76].mxu1 %v1100_v14  ;;  %v990_v38 = vmax.f32 %v647_v19, 0.0 }
 0x11e   : > { %v993_v35 = vmax.f32 %v842_v24, 0.0  ;;  %v653_v36 = vadd.f32 %v652_v33, %v2545_v27  ;;  %v846_v37 = vadd.f32 %v845_v34, %v2547_v2  ;;  %v991_v41 = vmax.f32 %v649_v23, 0.0 }
 0x11f   : > { %v994_v39 = vmax.f32 %v651_v31, 0.0  ;;  %v996_v40 = vmax.f32 %v844_v32, 0.0 }
 0x120   : > { %v995_v42 = vmax.f32 %v653_v36, 0.0  ;;  %v997_v43 = vmax.f32 %v846_v37, 0.0 }
 0x121   : > { %v1102_v44 = vpack.c.bf16 %v994_v39, %v990_v38  ;;  %v1104_v45 = vpack.c.bf16 %v996_v40, %v992_v30 }
 0x122   : > { %v1103_v46 = vpack.c.bf16 %v995_v42, %v991_v41  ;;  %v1105_v47 = vpack.c.bf16 %v997_v43, %v993_v35  ;;  %v656_v48 = vpop.f32.mrb[20].mxu0  ;;  %v849_v49 = vpop.f32.mrb[20].mxu1 }
 0x123   : > { %v657_v50 = vadd.f32 %v656_v48, %v2541_v25  ;;  %v850_v51 = vadd.f32 %v849_v49, %v2543_v26  ;;  %v658_v52 = vpop.f32.mrb[21].mxu0  ;;  %v851_v53 = vpop.f32.mrb[21].mxu1 }
 0x124   : > { %v659_v54 = vadd.f32 %v658_v52, %v2545_v27  ;;  %v852_v55 = vadd.f32 %v851_v53, %v2547_v2  ;;  %v660_v56 = vpop.f32.mrb[22].mxu0  ;;  %v853_v57 = vpop.f32.mrb[22].mxu1  ;;  %1476 = vmatprep.mubr.bf16.mxu0 %v1103_v46  ;;  %1637 = vmatprep.mubr.bf16.mxu1 %v1105_v47 }
 0x125   : > { %v1000_v58 = vmax.f32 %v850_v51, 0.0  ;;  %v661_v59 = vadd.f32 %v660_v56, %v2541_v25  ;;  %v854_v60 = vadd.f32 %v853_v57, %v2543_v26  ;;  %v662_v61 = vpop.f32.mrb[23].mxu0  ;;  %v855_v62 = vpop.f32.mrb[23].mxu1  ;;  %1477 = vmatmul.mubr.bf16.gmra.mrb[80].mxu0 %v1102_v44  ;;  %1638 = vmatmul.mubr.bf16.gmra.mrb[80].mxu1 %v1104_v45  ;;  %v998_v3 = vmax.f32 %v657_v50, 0.0 }
 0x126   : > { %v1001_v63 = vmax.f32 %v852_v55, 0.0  ;;  %v663_v0 = vadd.f32 %v662_v61, %v2545_v27  ;;  %v856_v1 = vadd.f32 %v855_v62, %v2547_v2  ;;  %v999_v6 = vmax.f32 %v659_v54, 0.0 }
 0x127   : > { %v1002_v4 = vmax.f32 %v661_v59, 0.0  ;;  %v1004_v5 = vmax.f32 %v854_v60, 0.0 }
 0x128   : > { %v1003_v7 = vmax.f32 %v663_v0, 0.0  ;;  %v1005_v8 = vmax.f32 %v856_v1, 0.0 }
 0x129   : > { %v1106_v9 = vpack.c.bf16 %v1002_v4, %v998_v3  ;;  %v1108_v10 = vpack.c.bf16 %v1004_v5, %v1000_v58 }
 0x12a   : > { %v1107_v11 = vpack.c.bf16 %v1003_v7, %v999_v6  ;;  %v1109_v12 = vpack.c.bf16 %v1005_v8, %v1001_v63  ;;  %v666_v13 = vpop.f32.mrb[24].mxu0  ;;  %v859_v14 = vpop.f32.mrb[24].mxu1 }
 0x12b   : > { %v667_v15 = vadd.f32 %v666_v13, %v2541_v25  ;;  %v860_v16 = vadd.f32 %v859_v14, %v2543_v26  ;;  %v668_v17 = vpop.f32.mrb[25].mxu0  ;;  %v861_v18 = vpop.f32.mrb[25].mxu1 }
 0x12c   : > { %v669_v19 = vadd.f32 %v668_v17, %v2545_v27  ;;  %v862_v20 = vadd.f32 %v861_v18, %v2547_v2  ;;  %v670_v21 = vpop.f32.mrb[26].mxu0  ;;  %v863_v22 = vpop.f32.mrb[26].mxu1  ;;  %1484 = vmatprep.mubr.bf16.mxu0 %v1107_v11  ;;  %1645 = vmatprep.mubr.bf16.mxu1 %v1109_v12 }
 0x12d   : > { %v1008_v23 = vmax.f32 %v860_v16, 0.0  ;;  %v671_v24 = vadd.f32 %v670_v21, %v2541_v25  ;;  %v864_v28 = vadd.f32 %v863_v22, %v2543_v26  ;;  %v672_v29 = vpop.f32.mrb[27].mxu0  ;;  %v865_v30 = vpop.f32.mrb[27].mxu1  ;;  %1485 = vmatmul.mubr.bf16.gmra.mrb[84].mxu0 %v1106_v9  ;;  %1646 = vmatmul.mubr.bf16.gmra.mrb[84].mxu1 %v1108_v10  ;;  %v1006_v34 = vmax.f32 %v667_v15, 0.0 }
 0x12e   : > { %v1009_v31 = vmax.f32 %v862_v20, 0.0  ;;  %v673_v32 = vadd.f32 %v672_v29, %v2545_v27  ;;  %v866_v33 = vadd.f32 %v865_v30, %v2547_v2  ;;  %v1007_v37 = vmax.f32 %v669_v19, 0.0 }
 0x12f   : > { %v1010_v35 = vmax.f32 %v671_v24, 0.0  ;;  %v1012_v36 = vmax.f32 %v864_v28, 0.0 }
 0x130   : > { %v1011_v38 = vmax.f32 %v673_v32, 0.0  ;;  %v1013_v39 = vmax.f32 %v866_v33, 0.0 }
 0x131   : > { %v1110_v40 = vpack.c.bf16 %v1010_v35, %v1006_v34  ;;  %v1112_v41 = vpack.c.bf16 %v1012_v36, %v1008_v23 }
 0x132   : > { %v1111_v42 = vpack.c.bf16 %v1011_v38, %v1007_v37  ;;  %v1113_v43 = vpack.c.bf16 %v1013_v39, %v1009_v31  ;;  %v676_v44 = vpop.f32.mrb[28].mxu0  ;;  %v869_v45 = vpop.f32.mrb[28].mxu1 }
 0x133   : > { %v677_v46 = vadd.f32 %v676_v44, %v2541_v25  ;;  %v870_v47 = vadd.f32 %v869_v45, %v2543_v26  ;;  %v678_v48 = vpop.f32.mrb[29].mxu0  ;;  %v871_v49 = vpop.f32.mrb[29].mxu1 }
 0x134   : > { %v679_v50 = vadd.f32 %v678_v48, %v2545_v27  ;;  %v872_v51 = vadd.f32 %v871_v49, %v2547_v2  ;;  %v680_v52 = vpop.f32.mrb[30].mxu0  ;;  %v873_v53 = vpop.f32.mrb[30].mxu1  ;;  %1492 = vmatprep.mubr.bf16.mxu0 %v1111_v42  ;;  %1653 = vmatprep.mubr.bf16.mxu1 %v1113_v43 }
 0x135   : > { %v1016_v54 = vmax.f32 %v870_v47, 0.0  ;;  %v681_v55 = vadd.f32 %v680_v52, %v2541_v25  ;;  %v874_v56 = vadd.f32 %v873_v53, %v2543_v26  ;;  %v682_v57 = vpop.f32.mrb[31].mxu0  ;;  %v875_v58 = vpop.f32.mrb[31].mxu1  ;;  %1493 = vmatmul.mubr.bf16.gmra.mrb[88].mxu0 %v1110_v40  ;;  %1654 = vmatmul.mubr.bf16.gmra.mrb[88].mxu1 %v1112_v41  ;;  %v1014_v62 = vmax.f32 %v677_v46, 0.0 }
 0x136   : > { %v1017_v59 = vmax.f32 %v872_v51, 0.0  ;;  %v683_v60 = vadd.f32 %v682_v57, %v2545_v27  ;;  %v876_v61 = vadd.f32 %v875_v58, %v2547_v2  ;;  %v1015_v1 = vmax.f32 %v679_v50, 0.0 }
 0x137   : > { %v1018_v63 = vmax.f32 %v681_v55, 0.0  ;;  %v1020_v0 = vmax.f32 %v874_v56, 0.0 }
 0x138   : > { %v1019_v3 = vmax.f32 %v683_v60, 0.0  ;;  %v1021_v4 = vmax.f32 %v876_v61, 0.0 }
 0x139   : > { %v1114_v5 = vpack.c.bf16 %v1018_v63, %v1014_v62  ;;  %v1116_v6 = vpack.c.bf16 %v1020_v0, %v1016_v54 }
 0x13a   : > { %v1115_v7 = vpack.c.bf16 %v1019_v3, %v1015_v1  ;;  %v1117_v8 = vpack.c.bf16 %v1021_v4, %v1017_v59  ;;  %v686_v9 = vpop.f32.mrb[32].mxu0  ;;  %v879_v10 = vpop.f32.mrb[32].mxu1 }
 0x13b   : > { %v687_v11 = vadd.f32 %v686_v9, %v2541_v25  ;;  %v880_v12 = vadd.f32 %v879_v10, %v2543_v26  ;;  %v688_v13 = vpop.f32.mrb[33].mxu0  ;;  %v881_v14 = vpop.f32.mrb[33].mxu1 }
 0x13c   : > { %v689_v15 = vadd.f32 %v688_v13, %v2545_v27  ;;  %v882_v16 = vadd.f32 %v881_v14, %v2547_v2  ;;  %v690_v17 = vpop.f32.mrb[34].mxu0  ;;  %v883_v18 = vpop.f32.mrb[34].mxu1  ;;  %1500 = vmatprep.mubr.bf16.mxu0 %v1115_v7  ;;  %1661 = vmatprep.mubr.bf16.mxu1 %v1117_v8 }
 0x13d   : > { %v1024_v19 = vmax.f32 %v880_v12, 0.0  ;;  %v691_v20 = vadd.f32 %v690_v17, %v2541_v25  ;;  %v884_v21 = vadd.f32 %v883_v18, %v2543_v26  ;;  %v692_v22 = vpop.f32.mrb[35].mxu0  ;;  %v885_v23 = vpop.f32.mrb[35].mxu1  ;;  %1501 = vmatmul.mubr.bf16.gmra.mrb[92].mxu0 %v1114_v5  ;;  %1662 = vmatmul.mubr.bf16.gmra.mrb[92].mxu1 %v1116_v6  ;;  %v1022_v30 = vmax.f32 %v687_v11, 0.0 }
 0x13e   : > { %v1025_v24 = vmax.f32 %v882_v16, 0.0  ;;  %v693_v28 = vadd.f32 %v692_v22, %v2545_v27  ;;  %v886_v29 = vadd.f32 %v885_v23, %v2547_v2  ;;  %v1023_v33 = vmax.f32 %v689_v15, 0.0 }
 0x13f   : > { %v1026_v31 = vmax.f32 %v691_v20, 0.0  ;;  %v1028_v32 = vmax.f32 %v884_v21, 0.0 }
 0x140   : > { %v1027_v34 = vmax.f32 %v693_v28, 0.0  ;;  %v1029_v35 = vmax.f32 %v886_v29, 0.0 }
 0x141   : > { %v1118_v36 = vpack.c.bf16 %v1026_v31, %v1022_v30  ;;  %v1120_v37 = vpack.c.bf16 %v1028_v32, %v1024_v19 }
 0x142   : > { %v1119_v38 = vpack.c.bf16 %v1027_v34, %v1023_v33  ;;  %v1121_v39 = vpack.c.bf16 %v1029_v35, %v1025_v24  ;;  %v696_v40 = vpop.f32.mrb[36].mxu0  ;;  %v889_v41 = vpop.f32.mrb[36].mxu1 }
 0x143   : > { %v697_v42 = vadd.f32 %v696_v40, %v2541_v25  ;;  %v890_v43 = vadd.f32 %v889_v41, %v2543_v26  ;;  %v698_v44 = vpop.f32.mrb[37].mxu0  ;;  %v891_v45 = vpop.f32.mrb[37].mxu1 }
 0x144   : > { %v699_v46 = vadd.f32 %v698_v44, %v2545_v27  ;;  %v892_v47 = vadd.f32 %v891_v45, %v2547_v2  ;;  %v700_v48 = vpop.f32.mrb[38].mxu0  ;;  %v893_v49 = vpop.f32.mrb[38].mxu1  ;;  %1508 = vmatprep.mubr.bf16.mxu0 %v1119_v38  ;;  %1669 = vmatprep.mubr.bf16.mxu1 %v1121_v39 }
 0x145   : > { %v1032_v50 = vmax.f32 %v890_v43, 0.0  ;;  %v701_v51 = vadd.f32 %v700_v48, %v2541_v25  ;;  %v894_v52 = vadd.f32 %v893_v49, %v2543_v26  ;;  %v702_v53 = vpop.f32.mrb[39].mxu0  ;;  %v895_v54 = vpop.f32.mrb[39].mxu1  ;;  %1509 = vmatmul.mubr.bf16.gmra.mrb[96].mxu0 %v1118_v36  ;;  %1670 = vmatmul.mubr.bf16.gmra.mrb[96].mxu1 %v1120_v37  ;;  %v1030_v58 = vmax.f32 %v697_v42, 0.0 }
 0x146   : > { %v1033_v55 = vmax.f32 %v892_v47, 0.0  ;;  %v703_v56 = vadd.f32 %v702_v53, %v2545_v27  ;;  %v896_v57 = vadd.f32 %v895_v54, %v2547_v2  ;;  %v1031_v61 = vmax.f32 %v699_v46, 0.0 }
 0x147   : > { %v1034_v59 = vmax.f32 %v701_v51, 0.0  ;;  %v1036_v60 = vmax.f32 %v894_v52, 0.0 }
 0x148   : > { %v1035_v62 = vmax.f32 %v703_v56, 0.0  ;;  %v1037_v63 = vmax.f32 %v896_v57, 0.0 }
 0x149   : > { %v1122_v0 = vpack.c.bf16 %v1034_v59, %v1030_v58  ;;  %v1124_v1 = vpack.c.bf16 %v1036_v60, %v1032_v50 }
 0x14a   : > { %v1123_v3 = vpack.c.bf16 %v1035_v62, %v1031_v61  ;;  %v1125_v4 = vpack.c.bf16 %v1037_v63, %v1033_v55  ;;  %v706_v5 = vpop.f32.mrb[40].mxu0  ;;  %v899_v6 = vpop.f32.mrb[40].mxu1 }
 0x14b   : > { %v707_v7 = vadd.f32 %v706_v5, %v2541_v25  ;;  %v900_v8 = vadd.f32 %v899_v6, %v2543_v26  ;;  %v708_v9 = vpop.f32.mrb[41].mxu0  ;;  %v901_v10 = vpop.f32.mrb[41].mxu1 }
 0x14c   : > { %v709_v11 = vadd.f32 %v708_v9, %v2545_v27  ;;  %v902_v12 = vadd.f32 %v901_v10, %v2547_v2  ;;  %v710_v13 = vpop.f32.mrb[42].mxu0  ;;  %v903_v14 = vpop.f32.mrb[42].mxu1  ;;  %1516 = vmatprep.mubr.bf16.mxu0 %v1123_v3  ;;  %1677 = vmatprep.mubr.bf16.mxu1 %v1125_v4 }
 0x14d   : > { %v1040_v15 = vmax.f32 %v900_v8, 0.0  ;;  %v711_v16 = vadd.f32 %v710_v13, %v2541_v25  ;;  %v904_v17 = vadd.f32 %v903_v14, %v2543_v26  ;;  %v712_v18 = vpop.f32.mrb[43].mxu0  ;;  %v905_v19 = vpop.f32.mrb[43].mxu1  ;;  %1517 = vmatmul.mubr.bf16.gmra.mrb[100].mxu0 %v1122_v0  ;;  %1678 = vmatmul.mubr.bf16.gmra.mrb[100].mxu1 %v1124_v1  ;;  %v1038_v23 = vmax.f32 %v707_v7, 0.0 }
 0x14e   : > { %v1041_v20 = vmax.f32 %v902_v12, 0.0  ;;  %v713_v21 = vadd.f32 %v712_v18, %v2545_v27  ;;  %v906_v22 = vadd.f32 %v905_v19, %v2547_v2  ;;  %v1039_v29 = vmax.f32 %v709_v11, 0.0 }
 0x14f   : > { %v1042_v24 = vmax.f32 %v711_v16, 0.0  ;;  %v1044_v28 = vmax.f32 %v904_v17, 0.0 }
 0x150   : > { %v1043_v30 = vmax.f32 %v713_v21, 0.0  ;;  %v1045_v31 = vmax.f32 %v906_v22, 0.0 }
 0x151   : > { %v1126_v32 = vpack.c.bf16 %v1042_v24, %v1038_v23  ;;  %v1128_v33 = vpack.c.bf16 %v1044_v28, %v1040_v15 }
 0x152   : > { %v1127_v34 = vpack.c.bf16 %v1043_v30, %v1039_v29  ;;  %v1129_v35 = vpack.c.bf16 %v1045_v31, %v1041_v20  ;;  %v716_v36 = vpop.f32.mrb[44].mxu0  ;;  %v909_v37 = vpop.f32.mrb[44].mxu1 }
 0x153   : > { %v717_v38 = vadd.f32 %v716_v36, %v2541_v25  ;;  %v910_v39 = vadd.f32 %v909_v37, %v2543_v26  ;;  %v718_v40 = vpop.f32.mrb[45].mxu0  ;;  %v911_v41 = vpop.f32.mrb[45].mxu1 }
 0x154   : > { %v719_v42 = vadd.f32 %v718_v40, %v2545_v27  ;;  %v912_v43 = vadd.f32 %v911_v41, %v2547_v2  ;;  %v720_v44 = vpop.f32.mrb[46].mxu0  ;;  %v913_v45 = vpop.f32.mrb[46].mxu1  ;;  %1524 = vmatprep.mubr.bf16.mxu0 %v1127_v34  ;;  %1685 = vmatprep.mubr.bf16.mxu1 %v1129_v35 }
 0x155   : > { %v1048_v46 = vmax.f32 %v910_v39, 0.0  ;;  %v721_v47 = vadd.f32 %v720_v44, %v2541_v25  ;;  %v914_v48 = vadd.f32 %v913_v45, %v2543_v26  ;;  %v722_v49 = vpop.f32.mrb[47].mxu0  ;;  %v915_v50 = vpop.f32.mrb[47].mxu1  ;;  %1525 = vmatmul.mubr.bf16.gmra.mrb[104].mxu0 %v1126_v32  ;;  %1686 = vmatmul.mubr.bf16.gmra.mrb[104].mxu1 %v1128_v33  ;;  %v1046_v54 = vmax.f32 %v717_v38, 0.0 }
 0x156   : > { %v1049_v51 = vmax.f32 %v912_v43, 0.0  ;;  %v723_v52 = vadd.f32 %v722_v49, %v2545_v27  ;;  %v916_v53 = vadd.f32 %v915_v50, %v2547_v2  ;;  %v1047_v57 = vmax.f32 %v719_v42, 0.0 }
 0x157   : > { %v1050_v55 = vmax.f32 %v721_v47, 0.0  ;;  %v1052_v56 = vmax.f32 %v914_v48, 0.0 }
 0x158   : > { %v1051_v58 = vmax.f32 %v723_v52, 0.0  ;;  %v1053_v59 = vmax.f32 %v916_v53, 0.0 }
 0x159   : > { %v1130_v60 = vpack.c.bf16 %v1050_v55, %v1046_v54  ;;  %v1132_v61 = vpack.c.bf16 %v1052_v56, %v1048_v46 }
 0x15a   : > { %v1131_v62 = vpack.c.bf16 %v1051_v58, %v1047_v57  ;;  %v1133_v63 = vpack.c.bf16 %v1053_v59, %v1049_v51  ;;  %v726_v0 = vpop.f32.mrb[48].mxu0  ;;  %v919_v1 = vpop.f32.mrb[48].mxu1 }
 0x15b   : > { %v727_v3 = vadd.f32 %v726_v0, %v2541_v25  ;;  %v920_v4 = vadd.f32 %v919_v1, %v2543_v26  ;;  %v728_v5 = vpop.f32.mrb[49].mxu0  ;;  %v921_v6 = vpop.f32.mrb[49].mxu1 }
 0x15c   : > { %v729_v7 = vadd.f32 %v728_v5, %v2545_v27  ;;  %v922_v8 = vadd.f32 %v921_v6, %v2547_v2  ;;  %v730_v9 = vpop.f32.mrb[50].mxu0  ;;  %v923_v10 = vpop.f32.mrb[50].mxu1  ;;  %1532 = vmatprep.mubr.bf16.mxu0 %v1131_v62  ;;  %1693 = vmatprep.mubr.bf16.mxu1 %v1133_v63 }
 0x15d   : > { %v1056_v11 = vmax.f32 %v920_v4, 0.0  ;;  %v731_v12 = vadd.f32 %v730_v9, %v2541_v25  ;;  %v924_v13 = vadd.f32 %v923_v10, %v2543_v26  ;;  %v732_v14 = vpop.f32.mrb[51].mxu0  ;;  %v925_v15 = vpop.f32.mrb[51].mxu1  ;;  %1533 = vmatmul.mubr.bf16.gmra.mrb[108].mxu0 %v1130_v60  ;;  %1694 = vmatmul.mubr.bf16.gmra.mrb[108].mxu1 %v1132_v61  ;;  %v1054_v19 = vmax.f32 %v727_v3, 0.0 }
 0x15e   : > { %v1057_v16 = vmax.f32 %v922_v8, 0.0  ;;  %v733_v17 = vadd.f32 %v732_v14, %v2545_v27  ;;  %v926_v18 = vadd.f32 %v925_v15, %v2547_v2  ;;  %v1055_v22 = vmax.f32 %v729_v7, 0.0 }
 0x15f   : > { %v1058_v20 = vmax.f32 %v731_v12, 0.0  ;;  %v1060_v21 = vmax.f32 %v924_v13, 0.0 }
 0x160   : > { %v1059_v23 = vmax.f32 %v733_v17, 0.0  ;;  %v1061_v24 = vmax.f32 %v926_v18, 0.0 }
 0x161   : > { %v1134_v28 = vpack.c.bf16 %v1058_v20, %v1054_v19  ;;  %v1136_v29 = vpack.c.bf16 %v1060_v21, %v1056_v11 }
 0x162   : > { %v1135_v30 = vpack.c.bf16 %v1059_v23, %v1055_v22  ;;  %v1137_v31 = vpack.c.bf16 %v1061_v24, %v1057_v16  ;;  %v736_v32 = vpop.f32.mrb[52].mxu0  ;;  %v929_v33 = vpop.f32.mrb[52].mxu1 }
 0x163   : > { %v737_v34 = vadd.f32 %v736_v32, %v2541_v25  ;;  %v930_v35 = vadd.f32 %v929_v33, %v2543_v26  ;;  %v738_v36 = vpop.f32.mrb[53].mxu0  ;;  %v931_v37 = vpop.f32.mrb[53].mxu1 }
 0x164   : > { %v739_v38 = vadd.f32 %v738_v36, %v2545_v27  ;;  %v932_v39 = vadd.f32 %v931_v37, %v2547_v2  ;;  %v740_v40 = vpop.f32.mrb[54].mxu0  ;;  %v933_v41 = vpop.f32.mrb[54].mxu1  ;;  %1540 = vmatprep.mubr.bf16.mxu0 %v1135_v30  ;;  %1701 = vmatprep.mubr.bf16.mxu1 %v1137_v31 }
 0x165   : > { %v1064_v42 = vmax.f32 %v930_v35, 0.0  ;;  %v741_v43 = vadd.f32 %v740_v40, %v2541_v25  ;;  %v934_v44 = vadd.f32 %v933_v41, %v2543_v26  ;;  %v742_v45 = vpop.f32.mrb[55].mxu0  ;;  %v935_v46 = vpop.f32.mrb[55].mxu1  ;;  %1541 = vmatmul.mubr.bf16.gmra.mrb[112].mxu0 %v1134_v28  ;;  %1702 = vmatmul.mubr.bf16.gmra.mrb[112].mxu1 %v1136_v29  ;;  %v1062_v50 = vmax.f32 %v737_v34, 0.0 }
 0x166   : > { %v1065_v47 = vmax.f32 %v932_v39, 0.0  ;;  %v743_v48 = vadd.f32 %v742_v45, %v2545_v27  ;;  %v936_v49 = vadd.f32 %v935_v46, %v2547_v2  ;;  %v1063_v53 = vmax.f32 %v739_v38, 0.0 }
 0x167   : > { %v1066_v51 = vmax.f32 %v741_v43, 0.0  ;;  %v1068_v52 = vmax.f32 %v934_v44, 0.0 }
 0x168   : > { %v1067_v54 = vmax.f32 %v743_v48, 0.0  ;;  %v1069_v55 = vmax.f32 %v936_v49, 0.0 }
 0x169   : > { %v1138_v56 = vpack.c.bf16 %v1066_v51, %v1062_v50  ;;  %v1140_v57 = vpack.c.bf16 %v1068_v52, %v1064_v42 }
 0x16a   : > { %v1139_v58 = vpack.c.bf16 %v1067_v54, %v1063_v53  ;;  %v1141_v59 = vpack.c.bf16 %v1069_v55, %v1065_v47  ;;  %v746_v60 = vpop.f32.mrb[56].mxu0  ;;  %v939_v61 = vpop.f32.mrb[56].mxu1 }
 0x16b   : > { %v747_v62 = vadd.f32 %v746_v60, %v2541_v25  ;;  %v940_v63 = vadd.f32 %v939_v61, %v2543_v26  ;;  %v748_v0 = vpop.f32.mrb[57].mxu0  ;;  %v941_v1 = vpop.f32.mrb[57].mxu1 }
 0x16c   : > { %v749_v3 = vadd.f32 %v748_v0, %v2545_v27  ;;  %v942_v4 = vadd.f32 %v941_v1, %v2547_v2  ;;  %v750_v5 = vpop.f32.mrb[58].mxu0  ;;  %v943_v6 = vpop.f32.mrb[58].mxu1  ;;  %1548 = vmatprep.mubr.bf16.mxu0 %v1139_v58  ;;  %1709 = vmatprep.mubr.bf16.mxu1 %v1141_v59 }
 0x16d   : > { %v1072_v7 = vmax.f32 %v940_v63, 0.0  ;;  %v751_v8 = vadd.f32 %v750_v5, %v2541_v25  ;;  %v944_v9 = vadd.f32 %v943_v6, %v2543_v26  ;;  %v752_v10 = vpop.f32.mrb[59].mxu0  ;;  %v945_v11 = vpop.f32.mrb[59].mxu1  ;;  %1549 = vmatmul.mubr.bf16.gmra.mrb[116].mxu0 %v1138_v56  ;;  %1710 = vmatmul.mubr.bf16.gmra.mrb[116].mxu1 %v1140_v57  ;;  %v1070_v15 = vmax.f32 %v747_v62, 0.0 }
 0x16e   : > { %v1073_v12 = vmax.f32 %v942_v4, 0.0  ;;  %v753_v13 = vadd.f32 %v752_v10, %v2545_v27  ;;  %v946_v14 = vadd.f32 %v945_v11, %v2547_v2  ;;  %v1071_v18 = vmax.f32 %v749_v3, 0.0 }
 0x16f   : > { %v1074_v16 = vmax.f32 %v751_v8, 0.0  ;;  %v1076_v17 = vmax.f32 %v944_v9, 0.0 }
 0x170   : > { %v1075_v19 = vmax.f32 %v753_v13, 0.0  ;;  %v1077_v20 = vmax.f32 %v946_v14, 0.0 }
 0x171   : > { %v1142_v21 = vpack.c.bf16 %v1074_v16, %v1070_v15  ;;  %v1144_v22 = vpack.c.bf16 %v1076_v17, %v1072_v7 }
 0x172   : > { %v1143_v23 = vpack.c.bf16 %v1075_v19, %v1071_v18  ;;  %v1145_v24 = vpack.c.bf16 %v1077_v20, %v1073_v12  ;;  %v756_v28 = vpop.f32.mrb[60].mxu0  ;;  %v949_v29 = vpop.f32.mrb[60].mxu1 }
 0x173   : > { %v757_v30 = vadd.f32 %v756_v28, %v2541_v25  ;;  %v950_v31 = vadd.f32 %v949_v29, %v2543_v26  ;;  %v758_v32 = vpop.f32.mrb[61].mxu0  ;;  %v951_v33 = vpop.f32.mrb[61].mxu1 }
 0x174   : > { %v759_v34 = vadd.f32 %v758_v32, %v2545_v27  ;;  %v952_v35 = vadd.f32 %v951_v33, %v2547_v2  ;;  %v760_v36 = vpop.f32.mrb[62].mxu0  ;;  %v953_v37 = vpop.f32.mrb[62].mxu1  ;;  %1556 = vmatprep.mubr.bf16.mxu0 %v1143_v23  ;;  %1717 = vmatprep.mubr.bf16.mxu1 %v1145_v24 }
 0x175   : > { %v1080_v38 = vmax.f32 %v950_v31, 0.0  ;;  %v761_v39 = vadd.f32 %v760_v36, %v2541_v25  ;;  %v954_v40 = vadd.f32 %v953_v37, %v2543_v26  ;;  %v762_v41 = vpop.f32.mrb[63].mxu0  ;;  %v955_v42 = vpop.f32.mrb[63].mxu1  ;;  %1557 = vmatmul.mubr.bf16.gmra.mrb[120].mxu0 %v1142_v21  ;;  %1718 = vmatmul.mubr.bf16.gmra.mrb[120].mxu1 %v1144_v22  ;;  %v1078_v46 = vmax.f32 %v757_v30, 0.0 }
 0x176   : > { %v1081_v43 = vmax.f32 %v952_v35, 0.0  ;;  %v763_v44 = vadd.f32 %v762_v41, %v2545_v27  ;;  %v956_v45 = vadd.f32 %v955_v42, %v2547_v2  ;;  %v1079_v49 = vmax.f32 %v759_v34, 0.0  ;;  %v2680_v27 = vld [vmem:[%s2759_s4] ss:$0 sm:$0xff] }
 0x177   : > { %v1082_v47 = vmax.f32 %v761_v39, 0.0  ;;  %v1084_v48 = vmax.f32 %v954_v40, 0.0 }
 0x178   : > { %v1083_v50 = vmax.f32 %v763_v44, 0.0  ;;  %v1085_v51 = vmax.f32 %v956_v45, 0.0 }
 0x179   : > { %v1146_v52 = vpack.c.bf16 %v1082_v47, %v1078_v46  ;;  %v1148_v25 = vpack.c.bf16 %v1084_v48, %v1080_v38 }
 0x17a   : > { %v1147_v53 = vpack.c.bf16 %v1083_v50, %v1079_v49  ;;  %v1149_v26 = vpack.c.bf16 %v1085_v51, %v1081_v43 }
 0x17c   : > { %1564 = vmatprep.mubr.bf16.mxu0 %v1147_v53  ;;  %1725 = vmatprep.mubr.bf16.mxu1 %v1149_v26 }
 0x17d   : > { %1565 = vmatmul.mubr.bf16.gmra.mrb[124].mxu0 %v1146_v52  ;;  %1726 = vmatmul.mubr.bf16.gmra.mrb[124].mxu1 %v1148_v25 }
 0x1d8   : > { %v1930_v54 = vpop.f32.mrb[64].mxu0  ;;  %v2042_v55 = vpop.f32.mrb[64].mxu1 }
 0x1d9   : > { %v1931_v2 = vpop.f32.mrb[65].mxu0  ;;  %v2043_v56 = vpop.f32.mrb[65].mxu1 }
 0x1da   : > { %v1932_v57 = vadd.f32 %v1931_v2, %v1930_v54  ;;  %v2044_v58 = vadd.f32 %v2043_v56, %v2042_v55  ;;  %v1933_v59 = vpop.f32.mrb[66].mxu0  ;;  %v2045_v60 = vpop.f32.mrb[66].mxu1 }
 0x1db   : > { %v1934_v61 = vpop.f32.mrb[67].mxu0  ;;  %v2046_v62 = vpop.f32.mrb[67].mxu1 }
 0x1dc   : > { %v1447_v63 = vadd.f32 %v1932_v57, %v2680_v27  ;;  %v1935_v0 = vadd.f32 %v1934_v61, %v1933_v59  ;;  %v2047_v1 = vadd.f32 %v2046_v62, %v2045_v60 }
 0x1de   : > { %v1608_v3 = vadd.f32 %v2044_v58, %v1447_v63  ;;  %v1450_v4 = vadd.f32 %v1935_v0, %v2680_v27 }
 0x1e0   : > { %1734 = vst [vmem:[%s2687_s19] sm:$0xff] %v1608_v3  ;;  %v1611_v5 = vadd.f32 %v2047_v1, %v1450_v4  ;;  %v1936_v6 = vpop.f32.mrb[68].mxu0  ;;  %v2048_v7 = vpop.f32.mrb[68].mxu1 }
 0x1e1   : > { %v1937_v8 = vpop.f32.mrb[69].mxu0  ;;  %v2049_v9 = vpop.f32.mrb[69].mxu1 }
 0x1e2   : > { %1735 = vst [vmem:[%s2687_s19 + $0x8] sm:$0xff] %v1611_v5  ;;  %v1938_v10 = vadd.f32 %v1937_v8, %v1936_v6  ;;  %v2050_v11 = vadd.f32 %v2049_v9, %v2048_v7  ;;  %v1939_v12 = vpop.f32.mrb[70].mxu0  ;;  %v2051_v13 = vpop.f32.mrb[70].mxu1 }
 0x1e3   : > { %v1940_v14 = vpop.f32.mrb[71].mxu0  ;;  %v2052_v15 = vpop.f32.mrb[71].mxu1 }
 0x1e4   : > { %v1455_v16 = vadd.f32 %v1938_v10, %v2680_v27  ;;  %v1941_v17 = vadd.f32 %v1940_v14, %v1939_v12  ;;  %v2053_v18 = vadd.f32 %v2052_v15, %v2051_v13 }
 0x1e6   : > { %v1616_v19 = vadd.f32 %v2050_v11, %v1455_v16  ;;  %v1458_v20 = vadd.f32 %v1941_v17, %v2680_v27 }
 0x1e8   : > { %1736 = vst [vmem:[%s2687_s19 + $0x10] sm:$0xff] %v1616_v19  ;;  %v1619_v21 = vadd.f32 %v2053_v18, %v1458_v20  ;;  %v1942_v22 = vpop.f32.mrb[72].mxu0  ;;  %v2054_v23 = vpop.f32.mrb[72].mxu1 }
 0x1e9   : > { %v1943_v24 = vpop.f32.mrb[73].mxu0  ;;  %v2055_v28 = vpop.f32.mrb[73].mxu1 }
 0x1ea   : > { %1737 = vst [vmem:[%s2687_s19 + $0x18] sm:$0xff] %v1619_v21  ;;  %v1944_v29 = vadd.f32 %v1943_v24, %v1942_v22  ;;  %v2056_v30 = vadd.f32 %v2055_v28, %v2054_v23  ;;  %v1945_v31 = vpop.f32.mrb[74].mxu0  ;;  %v2057_v32 = vpop.f32.mrb[74].mxu1 }
 0x1eb   : > { %v1946_v33 = vpop.f32.mrb[75].mxu0  ;;  %v2058_v34 = vpop.f32.mrb[75].mxu1 }
 0x1ec   : > { %v1463_v35 = vadd.f32 %v1944_v29, %v2680_v27  ;;  %v1947_v36 = vadd.f32 %v1946_v33, %v1945_v31  ;;  %v2059_v37 = vadd.f32 %v2058_v34, %v2057_v32 }
 0x1ee   : > { %v1624_v38 = vadd.f32 %v2056_v30, %v1463_v35  ;;  %v1466_v39 = vadd.f32 %v1947_v36, %v2680_v27 }
 0x1f0   : > { %1738 = vst [vmem:[%s2687_s19 + $0x20] sm:$0xff] %v1624_v38  ;;  %v1627_v40 = vadd.f32 %v2059_v37, %v1466_v39  ;;  %v1948_v41 = vpop.f32.mrb[76].mxu0  ;;  %v2060_v42 = vpop.f32.mrb[76].mxu1 }
 0x1f1   : > { %v1949_v43 = vpop.f32.mrb[77].mxu0  ;;  %v2061_v44 = vpop.f32.mrb[77].mxu1 }
 0x1f2   : > { %1739 = vst [vmem:[%s2687_s19 + $0x28] sm:$0xff] %v1627_v40  ;;  %v1950_v45 = vadd.f32 %v1949_v43, %v1948_v41  ;;  %v2062_v46 = vadd.f32 %v2061_v44, %v2060_v42  ;;  %v1951_v47 = vpop.f32.mrb[78].mxu0  ;;  %v2063_v48 = vpop.f32.mrb[78].mxu1 }
 0x1f3   : > { %v1952_v49 = vpop.f32.mrb[79].mxu0  ;;  %v2064_v50 = vpop.f32.mrb[79].mxu1 }
 0x1f4   : > { %v1471_v51 = vadd.f32 %v1950_v45, %v2680_v27  ;;  %v1953_v52 = vadd.f32 %v1952_v49, %v1951_v47  ;;  %v2065_v25 = vadd.f32 %v2064_v50, %v2063_v48 }
 0x1f6   : > { %v1632_v53 = vadd.f32 %v2062_v46, %v1471_v51  ;;  %v1474_v26 = vadd.f32 %v1953_v52, %v2680_v27 }
 0x1f8   : > { %1740 = vst [vmem:[%s2687_s19 + $0x30] sm:$0xff] %v1632_v53  ;;  %v1635_v54 = vadd.f32 %v2065_v25, %v1474_v26  ;;  %v1954_v55 = vpop.f32.mrb[80].mxu0  ;;  %v2066_v2 = vpop.f32.mrb[80].mxu1 }
 0x1f9   : > { %v1955_v56 = vpop.f32.mrb[81].mxu0  ;;  %v2067_v57 = vpop.f32.mrb[81].mxu1 }
 0x1fa   : > { %1741 = vst [vmem:[%s2687_s19 + $0x38] sm:$0xff] %v1635_v54  ;;  %v1956_v58 = vadd.f32 %v1955_v56, %v1954_v55  ;;  %v2068_v59 = vadd.f32 %v2067_v57, %v2066_v2  ;;  %v1957_v60 = vpop.f32.mrb[82].mxu0  ;;  %v2069_v61 = vpop.f32.mrb[82].mxu1 }
 0x1fb   : > { %v1958_v62 = vpop.f32.mrb[83].mxu0  ;;  %v2070_v63 = vpop.f32.mrb[83].mxu1 }
 0x1fc   : > { %v1479_v0 = vadd.f32 %v1956_v58, %v2680_v27  ;;  %v1959_v1 = vadd.f32 %v1958_v62, %v1957_v60  ;;  %v2071_v3 = vadd.f32 %v2070_v63, %v2069_v61 }
 0x1fe   : > { %v1640_v4 = vadd.f32 %v2068_v59, %v1479_v0  ;;  %v1482_v5 = vadd.f32 %v1959_v1, %v2680_v27 }
 0x200   : > { %1742 = vst [vmem:[%s2687_s19 + $0x40] sm:$0xff] %v1640_v4  ;;  %v1643_v6 = vadd.f32 %v2071_v3, %v1482_v5  ;;  %v1960_v7 = vpop.f32.mrb[84].mxu0  ;;  %v2072_v8 = vpop.f32.mrb[84].mxu1 }
 0x201   : > { %v1961_v9 = vpop.f32.mrb[85].mxu0  ;;  %v2073_v10 = vpop.f32.mrb[85].mxu1 }
 0x202   : > { %1743 = vst [vmem:[%s2687_s19 + $0x48] sm:$0xff] %v1643_v6  ;;  %v1962_v11 = vadd.f32 %v1961_v9, %v1960_v7  ;;  %v2074_v12 = vadd.f32 %v2073_v10, %v2072_v8  ;;  %v1963_v13 = vpop.f32.mrb[86].mxu0  ;;  %v2075_v14 = vpop.f32.mrb[86].mxu1 }
 0x203   : > { %v1964_v15 = vpop.f32.mrb[87].mxu0  ;;  %v2076_v16 = vpop.f32.mrb[87].mxu1 }
 0x204   : > { %v1487_v17 = vadd.f32 %v1962_v11, %v2680_v27  ;;  %v1965_v18 = vadd.f32 %v1964_v15, %v1963_v13  ;;  %v2077_v19 = vadd.f32 %v2076_v16, %v2075_v14 }
 0x206   : > { %v1648_v20 = vadd.f32 %v2074_v12, %v1487_v17  ;;  %v1490_v21 = vadd.f32 %v1965_v18, %v2680_v27 }
 0x208   : > { %1744 = vst [vmem:[%s2687_s19 + $0x50] sm:$0xff] %v1648_v20  ;;  %v1651_v22 = vadd.f32 %v2077_v19, %v1490_v21  ;;  %v1966_v23 = vpop.f32.mrb[88].mxu0  ;;  %v2078_v24 = vpop.f32.mrb[88].mxu1 }
 0x209   : > { %v1967_v28 = vpop.f32.mrb[89].mxu0  ;;  %v2079_v29 = vpop.f32.mrb[89].mxu1 }
 0x20a   : > { %1745 = vst [vmem:[%s2687_s19 + $0x58] sm:$0xff] %v1651_v22  ;;  %v1968_v30 = vadd.f32 %v1967_v28, %v1966_v23  ;;  %v2080_v31 = vadd.f32 %v2079_v29, %v2078_v24  ;;  %v1969_v32 = vpop.f32.mrb[90].mxu0  ;;  %v2081_v33 = vpop.f32.mrb[90].mxu1 }
 0x20b   : > { %v1970_v34 = vpop.f32.mrb[91].mxu0  ;;  %v2082_v35 = vpop.f32.mrb[91].mxu1 }
 0x20c   : > { %v1495_v36 = vadd.f32 %v1968_v30, %v2680_v27  ;;  %v1971_v37 = vadd.f32 %v1970_v34, %v1969_v32  ;;  %v2083_v38 = vadd.f32 %v2082_v35, %v2081_v33 }
 0x20e   : > { %v1656_v39 = vadd.f32 %v2080_v31, %v1495_v36  ;;  %v1498_v40 = vadd.f32 %v1971_v37, %v2680_v27 }
 0x210   : > { %1746 = vst [vmem:[%s2687_s19 + $0x60] sm:$0xff] %v1656_v39  ;;  %v1659_v41 = vadd.f32 %v2083_v38, %v1498_v40  ;;  %v1972_v42 = vpop.f32.mrb[92].mxu0  ;;  %v2084_v43 = vpop.f32.mrb[92].mxu1 }
 0x211   : > { %v1973_v44 = vpop.f32.mrb[93].mxu0  ;;  %v2085_v45 = vpop.f32.mrb[93].mxu1 }
 0x212   : > { %1747 = vst [vmem:[%s2687_s19 + $0x68] sm:$0xff] %v1659_v41  ;;  %v1974_v46 = vadd.f32 %v1973_v44, %v1972_v42  ;;  %v2086_v47 = vadd.f32 %v2085_v45, %v2084_v43  ;;  %v1975_v48 = vpop.f32.mrb[94].mxu0  ;;  %v2087_v49 = vpop.f32.mrb[94].mxu1 }
 0x213   : > { %v1976_v50 = vpop.f32.mrb[95].mxu0  ;;  %v2088_v51 = vpop.f32.mrb[95].mxu1 }
 0x214   : > { %v1503_v52 = vadd.f32 %v1974_v46, %v2680_v27  ;;  %v1977_v25 = vadd.f32 %v1976_v50, %v1975_v48  ;;  %v2089_v53 = vadd.f32 %v2088_v51, %v2087_v49 }
 0x216   : > { %v1664_v26 = vadd.f32 %v2086_v47, %v1503_v52  ;;  %v1506_v54 = vadd.f32 %v1977_v25, %v2680_v27 }
 0x218   : > { %1748 = vst [vmem:[%s2687_s19 + $0x70] sm:$0xff] %v1664_v26  ;;  %v1667_v55 = vadd.f32 %v2089_v53, %v1506_v54  ;;  %v1978_v2 = vpop.f32.mrb[96].mxu0  ;;  %v2090_v56 = vpop.f32.mrb[96].mxu1 }
 0x219   : > { %v1979_v57 = vpop.f32.mrb[97].mxu0  ;;  %v2091_v58 = vpop.f32.mrb[97].mxu1 }
 0x21a   : > { %1749 = vst [vmem:[%s2687_s19 + $0x78] sm:$0xff] %v1667_v55  ;;  %v1980_v59 = vadd.f32 %v1979_v57, %v1978_v2  ;;  %v2092_v60 = vadd.f32 %v2091_v58, %v2090_v56  ;;  %v1981_v61 = vpop.f32.mrb[98].mxu0  ;;  %v2093_v62 = vpop.f32.mrb[98].mxu1 }
 0x21b   : > { %v1982_v63 = vpop.f32.mrb[99].mxu0  ;;  %v2094_v0 = vpop.f32.mrb[99].mxu1 }
 0x21c   : > { %v1511_v1 = vadd.f32 %v1980_v59, %v2680_v27  ;;  %v1983_v3 = vadd.f32 %v1982_v63, %v1981_v61  ;;  %v2095_v4 = vadd.f32 %v2094_v0, %v2093_v62 }
 0x21e   : > { %v1672_v5 = vadd.f32 %v2092_v60, %v1511_v1  ;;  %v1514_v6 = vadd.f32 %v1983_v3, %v2680_v27 }
 0x220   : > { %1750 = vst [vmem:[%s2687_s19 + $0x80] sm:$0xff] %v1672_v5  ;;  %v1675_v7 = vadd.f32 %v2095_v4, %v1514_v6  ;;  %v1984_v8 = vpop.f32.mrb[100].mxu0  ;;  %v2096_v9 = vpop.f32.mrb[100].mxu1 }
 0x221   : > { %v1985_v10 = vpop.f32.mrb[101].mxu0  ;;  %v2097_v11 = vpop.f32.mrb[101].mxu1 }
 0x222   : > { %1751 = vst [vmem:[%s2687_s19 + $0x88] sm:$0xff] %v1675_v7  ;;  %v1986_v12 = vadd.f32 %v1985_v10, %v1984_v8  ;;  %v2098_v13 = vadd.f32 %v2097_v11, %v2096_v9  ;;  %v1987_v14 = vpop.f32.mrb[102].mxu0  ;;  %v2099_v15 = vpop.f32.mrb[102].mxu1 }
 0x223   : > { %v1988_v16 = vpop.f32.mrb[103].mxu0  ;;  %v2100_v17 = vpop.f32.mrb[103].mxu1 }
 0x224   : > { %v1519_v18 = vadd.f32 %v1986_v12, %v2680_v27  ;;  %v1989_v19 = vadd.f32 %v1988_v16, %v1987_v14  ;;  %v2101_v20 = vadd.f32 %v2100_v17, %v2099_v15 }
 0x226   : > { %v1680_v21 = vadd.f32 %v2098_v13, %v1519_v18  ;;  %v1522_v22 = vadd.f32 %v1989_v19, %v2680_v27 }
 0x228   : > { %1752 = vst [vmem:[%s2687_s19 + $0x90] sm:$0xff] %v1680_v21  ;;  %v1683_v23 = vadd.f32 %v2101_v20, %v1522_v22  ;;  %v1990_v24 = vpop.f32.mrb[104].mxu0  ;;  %v2102_v28 = vpop.f32.mrb[104].mxu1 }
 0x229   : > { %v1991_v29 = vpop.f32.mrb[105].mxu0  ;;  %v2103_v30 = vpop.f32.mrb[105].mxu1 }
 0x22a   : > { %1753 = vst [vmem:[%s2687_s19 + $0x98] sm:$0xff] %v1683_v23  ;;  %v1992_v31 = vadd.f32 %v1991_v29, %v1990_v24  ;;  %v2104_v32 = vadd.f32 %v2103_v30, %v2102_v28  ;;  %v1993_v33 = vpop.f32.mrb[106].mxu0  ;;  %v2105_v34 = vpop.f32.mrb[106].mxu1 }
 0x22b   : > { %v1994_v35 = vpop.f32.mrb[107].mxu0  ;;  %v2106_v36 = vpop.f32.mrb[107].mxu1 }
 0x22c   : > { %v1527_v37 = vadd.f32 %v1992_v31, %v2680_v27  ;;  %v1995_v38 = vadd.f32 %v1994_v35, %v1993_v33  ;;  %v2107_v39 = vadd.f32 %v2106_v36, %v2105_v34 }
 0x22e   : > { %v1688_v40 = vadd.f32 %v2104_v32, %v1527_v37  ;;  %v1530_v41 = vadd.f32 %v1995_v38, %v2680_v27 }
 0x230   : > { %1754 = vst [vmem:[%s2687_s19 + $0xa0] sm:$0xff] %v1688_v40  ;;  %v1691_v42 = vadd.f32 %v2107_v39, %v1530_v41  ;;  %v1996_v43 = vpop.f32.mrb[108].mxu0  ;;  %v2108_v44 = vpop.f32.mrb[108].mxu1 }
 0x231   : > { %v1997_v45 = vpop.f32.mrb[109].mxu0  ;;  %v2109_v46 = vpop.f32.mrb[109].mxu1 }
 0x232   : > { %1755 = vst [vmem:[%s2687_s19 + $0xa8] sm:$0xff] %v1691_v42  ;;  %v1998_v47 = vadd.f32 %v1997_v45, %v1996_v43  ;;  %v2110_v48 = vadd.f32 %v2109_v46, %v2108_v44  ;;  %v1999_v49 = vpop.f32.mrb[110].mxu0  ;;  %v2111_v50 = vpop.f32.mrb[110].mxu1 }
 0x233   : > { %v2000_v51 = vpop.f32.mrb[111].mxu0  ;;  %v2112_v52 = vpop.f32.mrb[111].mxu1 }
 0x234   : > { %v1535_v25 = vadd.f32 %v1998_v47, %v2680_v27  ;;  %v2001_v53 = vadd.f32 %v2000_v51, %v1999_v49  ;;  %v2113_v26 = vadd.f32 %v2112_v52, %v2111_v50 }
 0x236   : > { %v1696_v54 = vadd.f32 %v2110_v48, %v1535_v25  ;;  %v1538_v55 = vadd.f32 %v2001_v53, %v2680_v27 }
 0x238   : > { %1756 = vst [vmem:[%s2687_s19 + $0xb0] sm:$0xff] %v1696_v54  ;;  %v1699_v2 = vadd.f32 %v2113_v26, %v1538_v55  ;;  %v2002_v56 = vpop.f32.mrb[112].mxu0  ;;  %v2114_v57 = vpop.f32.mrb[112].mxu1 }
 0x239   : > { %v2003_v58 = vpop.f32.mrb[113].mxu0  ;;  %v2115_v59 = vpop.f32.mrb[113].mxu1 }
 0x23a   : > { %1757 = vst [vmem:[%s2687_s19 + $0xb8] sm:$0xff] %v1699_v2  ;;  %v2004_v60 = vadd.f32 %v2003_v58, %v2002_v56  ;;  %v2116_v61 = vadd.f32 %v2115_v59, %v2114_v57  ;;  %v2005_v62 = vpop.f32.mrb[114].mxu0  ;;  %v2117_v63 = vpop.f32.mrb[114].mxu1 }
 0x23b   : > { %v2006_v0 = vpop.f32.mrb[115].mxu0  ;;  %v2118_v1 = vpop.f32.mrb[115].mxu1 }
 0x23c   : > { %v1543_v3 = vadd.f32 %v2004_v60, %v2680_v27  ;;  %v2007_v4 = vadd.f32 %v2006_v0, %v2005_v62  ;;  %v2119_v5 = vadd.f32 %v2118_v1, %v2117_v63 }
 0x23e   : > { %v1704_v6 = vadd.f32 %v2116_v61, %v1543_v3  ;;  %v1546_v7 = vadd.f32 %v2007_v4, %v2680_v27 }
 0x240   : > { %1758 = vst [vmem:[%s2687_s19 + $0xc0] sm:$0xff] %v1704_v6  ;;  %v1707_v8 = vadd.f32 %v2119_v5, %v1546_v7  ;;  %v2008_v9 = vpop.f32.mrb[116].mxu0  ;;  %v2120_v10 = vpop.f32.mrb[116].mxu1 }
 0x241   : > { %v2009_v11 = vpop.f32.mrb[117].mxu0  ;;  %v2121_v12 = vpop.f32.mrb[117].mxu1 }
 0x242   : > { %1759 = vst [vmem:[%s2687_s19 + $0xc8] sm:$0xff] %v1707_v8  ;;  %v2010_v13 = vadd.f32 %v2009_v11, %v2008_v9  ;;  %v2122_v14 = vadd.f32 %v2121_v12, %v2120_v10  ;;  %v2011_v15 = vpop.f32.mrb[118].mxu0  ;;  %v2123_v16 = vpop.f32.mrb[118].mxu1 }
 0x243   : > { %v2012_v17 = vpop.f32.mrb[119].mxu0  ;;  %v2124_v18 = vpop.f32.mrb[119].mxu1 }
 0x244   : > { %v1551_v19 = vadd.f32 %v2010_v13, %v2680_v27  ;;  %v2013_v20 = vadd.f32 %v2012_v17, %v2011_v15  ;;  %v2125_v21 = vadd.f32 %v2124_v18, %v2123_v16 }
 0x246   : > { %v1712_v22 = vadd.f32 %v2122_v14, %v1551_v19  ;;  %v1554_v23 = vadd.f32 %v2013_v20, %v2680_v27 }
 0x248   : > { %1760 = vst [vmem:[%s2687_s19 + $0xd0] sm:$0xff] %v1712_v22  ;;  %v1715_v24 = vadd.f32 %v2125_v21, %v1554_v23  ;;  %v2014_v28 = vpop.f32.mrb[120].mxu0  ;;  %v2126_v29 = vpop.f32.mrb[120].mxu1 }
 0x249   : > { %v2015_v30 = vpop.f32.mrb[121].mxu0  ;;  %v2127_v31 = vpop.f32.mrb[121].mxu1 }
 0x24a   : > { %1761 = vst [vmem:[%s2687_s19 + $0xd8] sm:$0xff] %v1715_v24  ;;  %v2016_v32 = vadd.f32 %v2015_v30, %v2014_v28  ;;  %v2128_v33 = vadd.f32 %v2127_v31, %v2126_v29  ;;  %v2017_v34 = vpop.f32.mrb[122].mxu0  ;;  %v2129_v35 = vpop.f32.mrb[122].mxu1 }
 0x24b   : > { %v2018_v36 = vpop.f32.mrb[123].mxu0  ;;  %v2130_v37 = vpop.f32.mrb[123].mxu1 }
 0x24c   : > { %v1559_v38 = vadd.f32 %v2016_v32, %v2680_v27  ;;  %v2019_v39 = vadd.f32 %v2018_v36, %v2017_v34  ;;  %v2131_v40 = vadd.f32 %v2130_v37, %v2129_v35 }
 0x24e   : > { %v1720_v41 = vadd.f32 %v2128_v33, %v1559_v38  ;;  %v1562_v42 = vadd.f32 %v2019_v39, %v2680_v27 }
 0x250   : > { %1762 = vst [vmem:[%s2687_s19 + $0xe0] sm:$0xff] %v1720_v41  ;;  %v1723_v43 = vadd.f32 %v2131_v40, %v1562_v42  ;;  %v2020_v44 = vpop.f32.mrb[124].mxu0  ;;  %v2132_v45 = vpop.f32.mrb[124].mxu1 }
 0x251   : > { %v2021_v46 = vpop.f32.mrb[125].mxu0  ;;  %v2133_v47 = vpop.f32.mrb[125].mxu1 }
 0x252   : > { %1763 = vst [vmem:[%s2687_s19 + $0xe8] sm:$0xff] %v1723_v43  ;;  %v2022_v48 = vadd.f32 %v2021_v46, %v2020_v44  ;;  %v2134_v49 = vadd.f32 %v2133_v47, %v2132_v45  ;;  %v2023_v50 = vpop.f32.mrb[126].mxu0  ;;  %v2135_v51 = vpop.f32.mrb[126].mxu1 }
 0x253   : > { %v2024_v52 = vpop.f32.mrb[127].mxu0  ;;  %v2136_v25 = vpop.f32.mrb[127].mxu1 }
 0x254   : > { %v1567_v53 = vadd.f32 %v2022_v48, %v2680_v27  ;;  %v2025_v26 = vadd.f32 %v2024_v52, %v2023_v50  ;;  %v2137_v54 = vadd.f32 %v2136_v25, %v2135_v51 }
 0x256   : > { %v1728_v55 = vadd.f32 %v2134_v49, %v1567_v53  ;;  %v1570_v2 = vadd.f32 %v2025_v26, %v2680_v27 }
 0x258   : > { %1764 = vst [vmem:[%s2687_s19 + $0xf0] sm:$0xff] %v1728_v55  ;;  %v1731_v56 = vadd.f32 %v2137_v54, %v1570_v2 }
 0x25a   : > { %1765 = vst [vmem:[%s2687_s19 + $0xf8] sm:$0xff] %v1731_v56 }
 0x25b PF: > { %s15_s18 = sadd.s32 1, %s2249_s18  }
 0x25c   : > { %p12_p4 = scmp.ge.s32.totalorder %s15_s18, 4  }
 0x25e   :  { %14 = sbr.rel (!%p12_p4) target bundleno = 1 (0x1), region = 70 }

</bundles_post_ra>
